<compile_context>
chip_gen: v5e
topology: v5e:2x2
jax: 0.10.0
libtpu: 0.0.40
codegen_flags: <defaults>
</compile_context>

<pallas_src>
import math
import functools

import jax
import jax.numpy as jnp
from jax.experimental import pallas as pl
from jax.experimental.pallas import tpu as pltpu


def _round_up(x, m):
    return ((x + m - 1) // m) * m


def _choose_tb(nt, v):
    # Target ~512 rows (TB*V) per grid step to amortize per-step pipeline overhead and
    # give the MXU a useful M; keep TB a multiple of 8 (sublane aligned) and keep >= 2
    # grid steps when there are enough frames (v7x has 2 TensorCores per chip).
    tb = _round_up(max(1, 512 // max(v, 1)), 8)
    if nt <= tb:
        tb = min(_round_up(max(1, (nt + 1) // 2), 8), _round_up(nt, 8))
    return tb


def sa_gc_kernel(x_ref, lnw_ref, lnb_ref, wqk_ref, bqk_ref, topo_ref,
                 wcm_ref, shift_ref, o_ref,
                 *, n_heads, head_dim, scale, mxu_dtype, approx_softmax):
    tb, v, c = x_ref.shape
    c_out = shift_ref.shape[-1]
    inner = n_heads * head_dim

    x = x_ref[...]                               # (TB, V, C) f32 frame batch
    xf = x.reshape(tb * v, c)                    # leading-dim merge (free)

    # ---- LayerNorm over channels (one-pass variance) ----
    mu = jnp.mean(xf, axis=-1, keepdims=True)
    ex2 = jnp.mean(xf * xf, axis=-1, keepdims=True)
    y = (xf - mu) * jax.lax.rsqrt(ex2 - mu * mu + 1e-5)
    y = y * lnw_ref[...] + lnb_ref[...]          # (TB*V, C)

    # ---- to_qk linear (f32: feeds softmax logits, precision sensitive) ----
    qk = jnp.dot(y, wqk_ref[...], preferred_element_type=jnp.float32) + bqk_ref[...]
    qk3 = qk.reshape(tb, v, 2 * inner)           # (TB, V, 2*inner)

    # ---- one merged MXU matmul: X @ (BN-folded, head-concatenated conv weights) ----
    #   sum_h (A_h @ X) @ (W_h*s)  ==  sum_h A_h @ (X @ (W_h*s))
    xw = jnp.dot(xf.astype(mxu_dtype), wcm_ref[...].astype(mxu_dtype),
                 preferred_element_type=jnp.float32)          # (TB*V, H*c_out)

    acc = jnp.zeros((tb, v, c_out), jnp.float32)
    for h in range(n_heads):                     # static, fully unrolled (3 heads)
        q = qk3[:, :, h * head_dim:(h + 1) * head_dim]                     # (TB, V, d)
        k = qk3[:, :, inner + h * head_dim: inner + (h + 1) * head_dim]    # (TB, V, d)
        dots = jnp.einsum('bid,bjd->bij', q, k,
                          preferred_element_type=jnp.float32) * scale      # (TB, V, V)
        dots = dots - jnp.max(dots, axis=-1, keepdims=True)
        e = jnp.exp(dots)
        denom = jnp.sum(e, axis=-1, keepdims=True)
        if approx_softmax:
            attn = e * pl.reciprocal(denom, approx=True)     # EUP slot, nearly free
        else:
            attn = e / denom
        a = attn * topo_ref[h]                   # attn * shared_topology  (TB, V, V)
        xw_h = xw[:, h * c_out:(h + 1) * c_out].reshape(tb, v, c_out)
        acc = acc + jnp.einsum('bij,bjk->bik',
                               a.astype(mxu_dtype), xw_h.astype(mxu_dtype),
                               preferred_element_type=jnp.float32)

    # ---- folded BN/bias shift + identity residual + ReLU ----
    out = acc.reshape(tb * v, c_out) + shift_ref[...] + xf
    o_ref[...] = jnp.maximum(out, 0.0).astype(o_ref.dtype)


def sa_gc_forward(x, params, *, mxu_dtype=jnp.bfloat16, approx_softmax=True, tb=None):
    # x: (N, C, T, V) float32 (PyTorch NCHW convention)
    N, C, T, V = x.shape
    H = params["n_heads"]
    d = params["head_dim"]
    wc = params["wc"]                                           # (H, C, c_out)
    c_out = wc.shape[2]
    if C != c_out:
        # TODO(synk): projection `down` (1x1 conv + BN) path for c_in != c_out not implemented.
        raise NotImplementedError("identity residual requires in_channels == out_channels")

    # ---- fold BN (eval) and conv biases into the merged conv weights / one shift ----
    inv = params["bn_gamma"] / jnp.sqrt(params["bn_var"] + 1e-5)            # (c_out,)
    wcm = (wc * inv[None, None, :]).transpose(1, 0, 2).reshape(C, H * c_out)
    shift = (jnp.sum(params["bc"], axis=0) * inv
             + params["bn_beta"] - params["bn_mean"] * inv).reshape(1, c_out)

    nt = N * T
    if tb is None:
        tb = _choose_tb(nt, V)
    grid = pl.cdiv(nt, tb)
    nt_pad = grid * tb

    # TODO(synk): the NCHW -> frames transpose (and the inverse at the end) are wrapper-side
    # HBM round trips; a channels-last layout end-to-end would remove them.
    x_feat = jnp.transpose(x, (0, 2, 3, 1)).reshape(nt, V, C)               # (NT, V, C)
    if nt_pad != nt:
        x_feat = jnp.pad(x_feat, ((0, nt_pad - nt), (0, 0), (0, 0)))        # zero pad is safe

    inner2 = 2 * H * d
    kernel = functools.partial(
        sa_gc_kernel, n_heads=H, head_dim=d, scale=d ** (-0.5),
        mxu_dtype=mxu_dtype, approx_softmax=approx_softmax)

    # TODO(synk): output minor dim is c_out (< 128 lanes -> masked stores); a lane-dense
    # (TB, V*c_out) output slab would need an in-kernel sublane->lane relayout and the
    # store path is not the bottleneck at these channel counts.
    out = pl.pallas_call(
        kernel,
        out_shape=jax.ShapeDtypeStruct((nt_pad * V, c_out), jnp.float32),
        grid_spec=pltpu.PrefetchScalarGridSpec(
            num_scalar_prefetch=0,
            grid=(grid,),
            in_specs=[
                pl.BlockSpec((tb, V, C), lambda b: (b, 0, 0)),        # frame batch
                pl.BlockSpec((1, C), lambda b: (0, 0)),               # LN weight
                pl.BlockSpec((1, C), lambda b: (0, 0)),               # LN bias
                pl.BlockSpec((C, inner2), lambda b: (0, 0)),          # Wqk
                pl.BlockSpec((1, inner2), lambda b: (0, 0)),          # bqk
                pl.BlockSpec((H, V, V), lambda b: (0, 0, 0)),         # shared topology
                pl.BlockSpec((C, H * c_out), lambda b: (0, 0)),       # merged BN-folded conv W
                pl.BlockSpec((1, c_out), lambda b: (0, 0)),           # folded shift
            ],
            out_specs=pl.BlockSpec((tb * V, c_out), lambda b: (b, 0)),
        ),
        compiler_params=pltpu.CompilerParams(dimension_semantics=("parallel",)),
    )(x_feat,
      params["ln_w"].reshape(1, C), params["ln_b"].reshape(1, C),
      params["wqk"], params["bqk"].reshape(1, inner2),
      params["topo"], wcm, shift)

    out = out[: nt * V].reshape(N, T, V, c_out).transpose(0, 3, 1, 2)       # (N, C_out, T, V)
    return out


def init_params(key, c_in, c_out, v, n_heads=3):
    """Deterministic synthetic parameters matching SA_GC.__init__ shapes/inits."""
    rel = c_in // 8                              # rel_channels == per-head attention dim
    inner = rel * n_heads
    k0, k1, k2, k3 = jax.random.split(key, 4)

    topo = jax.random.uniform(k0, (n_heads, v, v), jnp.float32)    # shared_topology A

    ln_w = jnp.ones((c_in,), jnp.float32)                          # LayerNorm defaults
    ln_b = jnp.zeros((c_in,), jnp.float32)

    # to_qk: nn.Linear(c_in, 2*inner); weight ~ N(0,1), bias ~ U(-1/sqrt(c_in), 1/sqrt(c_in))
    wqk = jax.random.normal(k1, (c_in, 2 * inner), jnp.float32)
    bound = 1.0 / math.sqrt(c_in)
    bqk = jax.random.uniform(k2, (2 * inner,), jnp.float32, -bound, bound)

    # conv_d[h]: Conv2d(c_in, c_out, 1); conv_branch_init -> N(0, sqrt(2/(c_out*c_in*1*H))), bias 0
    std = math.sqrt(2.0 / (c_out * c_in * 1 * n_heads))
    wc = jax.random.normal(k3, (n_heads, c_in, c_out), jnp.float32) * std
    bc = jnp.zeros((n_heads, c_out), jnp.float32)

    # bn_init(self.bn, 1e-6): gamma=1e-6, beta=0; running stats at init.
    bn_gamma = jnp.full((c_out,), 1e-6, jnp.float32)
    bn_beta = jnp.zeros((c_out,), jnp.float32)
    bn_mean = jnp.zeros((c_out,), jnp.float32)
    bn_var = jnp.ones((c_out,), jnp.float32)

    return dict(topo=topo, ln_w=ln_w, ln_b=ln_b, wqk=wqk, bqk=bqk, wc=wc, bc=bc,
                bn_gamma=bn_gamma, bn_beta=bn_beta, bn_mean=bn_mean, bn_var=bn_var,
                n_heads=n_heads, head_dim=rel)


def make_validation_params(params, key):
    """Non-trivial BN/bias so the attention/conv branch materially affects the output
    (with the module's gamma=1e-6 init the branch is invisible to an allclose check)."""
    c_out = params["wc"].shape[2]
    n_heads = params["n_heads"]
    k1, k2, k3, k4, k5 = jax.random.split(key, 5)
    p = dict(params)
    p["bn_gamma"] = jax.random.uniform(k1, (c_out,), jnp.float32, 0.5, 1.5)
    p["bn_beta"] = 0.1 * jax.random.normal(k2, (c_out,), jnp.float32)
    p["bn_mean"] = 0.1 * jax.random.normal(k3, (c_out,), jnp.float32)
    p["bn_var"] = jax.random.uniform(k4, (c_out,), jnp.float32, 0.5, 1.5)
    p["bc"] = 0.1 * jax.random.normal(k5, (n_heads, c_out), jnp.float32)
    return p


def sa_gc_reference(x, params):
    """Pure-JAX reference with the same (eval-mode BN) semantics as the PyTorch module."""
    N, C, T, V = x.shape
    H, d = params["n_heads"], params["head_dim"]
    inner = H * d
    xf = jnp.transpose(x, (0, 2, 3, 1)).reshape(N * T, V, C)
    mu = xf.mean(-1, keepdims=True)
    var = ((xf - mu) ** 2).mean(-1, keepdims=True)
    y = (xf - mu) / jnp.sqrt(var + 1e-5) * params["ln_w"] + params["ln_b"]
    qk = y @ params["wqk"] + params["bqk"]
    q, k = qk[..., :inner], qk[..., inner:]
    q = q.reshape(N * T, V, H, d).transpose(0, 2, 1, 3)
    k = k.reshape(N * T, V, H, d).transpose(0, 2, 1, 3)
    dots = jnp.einsum("bhid,bhjd->bhij", q, k) * (d ** -0.5)
    attn = jax.nn.softmax(dots, axis=-1)
    A = attn * params["topo"][None]
    c_out = params["wc"].shape[2]
    out = jnp.zeros((N * T, V, c_out), jnp.float32)
    for h in range(H):
        z = A[:, h] @ xf
        out = out + (z @ params["wc"][h] + params["bc"][h])
    inv = params["bn_gamma"] / jnp.sqrt(params["bn_var"] + 1e-5)
    out = (out - params["bn_mean"]) * inv + params["bn_beta"]
    out = out + xf                               # identity `down` (C_in == C_out)
    out = jnp.maximum(out, 0.0)
    return out.reshape(N, T, V, c_out).transpose(0, 3, 1, 2)


if __name__ == "__main__":
    # Small shapes consistent with SA_GC: N=2, C_in=C_out=32 (rel_channels=4), T=8, V=8 joints.
    N, C, T, V = 2, 32, 8, 8
    key = jax.random.PRNGKey(0)
    kx, kp, kv = jax.random.split(key, 3)
    x = jax.random.normal(kx, (N, C, T, V), jnp.float32)

    params = init_params(kp, C, C, V)                      # module-faithful init (gamma=1e-6)
    vparams = make_validation_params(params, kv)           # non-trivial BN/bias for validation

    ref = sa_gc_reference(x, vparams)

    # Precise mode: f32 MXU operands + exact softmax division.
    out_f32 = sa_gc_forward(x, vparams, mxu_dtype=jnp.float32, approx_softmax=False)
    jax.block_until_ready(out_f32)
    assert out_f32.shape == (N, C, T, V)
    err32 = float(jnp.max(jnp.abs(out_f32 - ref)))
    assert jnp.allclose(out_f32, ref, atol=2e-2, rtol=2e-2), f"f32 path max err {err32:.3e}"

    # Fast mode (default): bf16 MXU operands + approx reciprocal (v6e/v7x path), looser check.
    out_bf16 = sa_gc_forward(x, vparams)
    jax.block_until_ready(out_bf16)
    errbf = float(jnp.max(jnp.abs(out_bf16 - ref)))
    assert jnp.allclose(out_bf16, ref, atol=1e-1, rtol=1e-1), f"bf16 path max err {errbf:.3e}"

    # Module-faithful init also runs through the default (fast) path.
    out_init = sa_gc_forward(x, params)
    jax.block_until_ready(out_init)
    assert out_init.shape == (N, C, T, V)

    print("KERNEL_OK")
</pallas_src>

<mosaic_0001>
module attributes {stable_mosaic.version = 11 : i64} {
  func.func @sa_gc_kernel(%arg0: i32, %arg1: memref<8x8x32xf32, #tpu.memory_space<vmem>>, %arg2: memref<1x32xf32, #tpu.memory_space<vmem>>, %arg3: memref<1x32xf32, #tpu.memory_space<vmem>>, %arg4: memref<32x24xf32, #tpu.memory_space<vmem>>, %arg5: memref<1x24xf32, #tpu.memory_space<vmem>>, %arg6: memref<3x8x8xf32, #tpu.memory_space<vmem>>, %arg7: memref<32x96xf32, #tpu.memory_space<vmem>>, %arg8: memref<1x32xf32, #tpu.memory_space<vmem>>, %arg9: memref<64x32xf32, #tpu.memory_space<vmem>>) attributes {dimension_semantics = [#tpu.dimension_semantics<parallel>], iteration_bounds = array<i64: 2>, scalar_prefetch = 0 : i64, scratch_operands = 0 : i64, tpu.core_type = #tpu.core_type<tc>, window_params = [{transform_indices = @transform_0, window_bounds = array<i64: 8, 8, 32>}, {pipeline_mode = #tpu.pipeline_mode<synchronous>, transform_indices = @transform_1, window_bounds = array<i64: 1, 32>}, {pipeline_mode = #tpu.pipeline_mode<synchronous>, transform_indices = @transform_2, window_bounds = array<i64: 1, 32>}, {pipeline_mode = #tpu.pipeline_mode<synchronous>, transform_indices = @transform_3, window_bounds = array<i64: 32, 24>}, {pipeline_mode = #tpu.pipeline_mode<synchronous>, transform_indices = @transform_4, window_bounds = array<i64: 1, 24>}, {pipeline_mode = #tpu.pipeline_mode<synchronous>, transform_indices = @transform_5, window_bounds = array<i64: 3, 8, 8>}, {pipeline_mode = #tpu.pipeline_mode<synchronous>, transform_indices = @transform_6, window_bounds = array<i64: 32, 96>}, {pipeline_mode = #tpu.pipeline_mode<synchronous>, transform_indices = @transform_7, window_bounds = array<i64: 1, 32>}, {transform_indices = @transform_8, window_bounds = array<i64: 64, 32>}]} {
    %c0 = arith.constant 0 : index
    %c0_0 = arith.constant 0 : index
    %c0_1 = arith.constant 0 : index
    %0 = vector.load %arg1[%c0, %c0_0, %c0_1] : memref<8x8x32xf32, #tpu.memory_space<vmem>>, vector<8x8x32xf32>
    %1 = vector.shape_cast %0 : vector<8x8x32xf32> to vector<64x32xf32>
    %cst = arith.constant dense<0.000000e+00> : vector<64xf32>
    %2 = vector.multi_reduction <add>, %1, %cst [1] : vector<64x32xf32> to vector<64xf32>
    %3 = vector.shape_cast %2 : vector<64xf32> to vector<64x1xf32>
    %cst_2 = arith.constant 3.200000e+01 : f32
    %4 = vector.broadcast %cst_2 : f32 to vector<64x1xf32>
    %5 = arith.divf %3, %4 : vector<64x1xf32>
    %6 = arith.mulf %1, %1 : vector<64x32xf32>
    %cst_3 = arith.constant dense<0.000000e+00> : vector<64xf32>
    %7 = vector.multi_reduction <add>, %6, %cst_3 [1] : vector<64x32xf32> to vector<64xf32>
    %8 = vector.shape_cast %7 : vector<64xf32> to vector<64x1xf32>
    %cst_4 = arith.constant 3.200000e+01 : f32
    %9 = vector.broadcast %cst_4 : f32 to vector<64x1xf32>
    %10 = arith.divf %8, %9 : vector<64x1xf32>
    %11 = vector.broadcast %5 : vector<64x1xf32> to vector<64x32xf32>
    %12 = arith.subf %1, %11 : vector<64x32xf32>
    %13 = arith.mulf %5, %5 : vector<64x1xf32>
    %14 = arith.subf %10, %13 : vector<64x1xf32>
    %cst_5 = arith.constant 9.99999974E-6 : f32
    %15 = vector.broadcast %cst_5 : f32 to vector<64x1xf32>
    %16 = arith.addf %14, %15 : vector<64x1xf32>
    %17 = math.rsqrt %16 : vector<64x1xf32>
    %18 = vector.broadcast %17 : vector<64x1xf32> to vector<64x32xf32>
    %19 = arith.mulf %12, %18 : vector<64x32xf32>
    %c0_6 = arith.constant 0 : index
    %c0_7 = arith.constant 0 : index
    %20 = vector.load %arg2[%c0_6, %c0_7] : memref<1x32xf32, #tpu.memory_space<vmem>>, vector<1x32xf32>
    %21 = vector.broadcast %20 : vector<1x32xf32> to vector<64x32xf32>
    %22 = arith.mulf %19, %21 : vector<64x32xf32>
    %c0_8 = arith.constant 0 : index
    %c0_9 = arith.constant 0 : index
    %23 = vector.load %arg3[%c0_8, %c0_9] : memref<1x32xf32, #tpu.memory_space<vmem>>, vector<1x32xf32>
    %24 = vector.broadcast %23 : vector<1x32xf32> to vector<64x32xf32>
    %25 = arith.addf %22, %24 : vector<64x32xf32>
    %c0_10 = arith.constant 0 : index
    %c0_11 = arith.constant 0 : index
    %26 = vector.load %arg4[%c0_10, %c0_11] : memref<32x24xf32, #tpu.memory_space<vmem>>, vector<32x24xf32>
    %cst_12 = arith.constant dense<0.000000e+00> : vector<64x24xf32>
    %27 = tpu.matmul %25, %26, %cst_12 {dimension_numbers = #tpu.dot_dimension_numbers<[1], [0], [0], [1], [0, 0, 1, 1], [], []>} : vector<64x32xf32>, vector<32x24xf32>, vector<64x24xf32> -> vector<64x24xf32>
    %c0_13 = arith.constant 0 : index
    %c0_14 = arith.constant 0 : index
    %28 = vector.load %arg5[%c0_13, %c0_14] : memref<1x24xf32, #tpu.memory_space<vmem>>, vector<1x24xf32>
    %29 = vector.broadcast %28 : vector<1x24xf32> to vector<64x24xf32>
    %30 = arith.addf %27, %29 : vector<64x24xf32>
    %31 = vector.shape_cast %30 : vector<64x24xf32> to vector<8x8x24xf32>
    %c0_15 = arith.constant 0 : index
    %c0_16 = arith.constant 0 : index
    %32 = vector.load %arg7[%c0_15, %c0_16] : memref<32x96xf32, #tpu.memory_space<vmem>>, vector<32x96xf32>
    %cst_17 = arith.constant dense<0.000000e+00> : vector<64x96xf32>
    %33 = tpu.matmul %1, %32, %cst_17 {dimension_numbers = #tpu.dot_dimension_numbers<[1], [0], [0], [1], [0, 0, 1, 1], [], []>} : vector<64x32xf32>, vector<32x96xf32>, vector<64x96xf32> -> vector<64x96xf32>
    %cst_18 = arith.constant 0.000000e+00 : f32
    %34 = vector.broadcast %cst_18 : f32 to vector<8x8x32xf32>
    %35 = vector.extract_strided_slice %31 {offsets = [0, 0, 0], sizes = [8, 8, 4], strides = [1, 1, 1]} : vector<8x8x24xf32> to vector<8x8x4xf32>
    %36 = vector.extract_strided_slice %31 {offsets = [0, 0, 12], sizes = [8, 8, 4], strides = [1, 1, 1]} : vector<8x8x24xf32> to vector<8x8x4xf32>
    "tpu.trace_start"() <{level = 10 : i32, message = "bid,bjd->bij"}> : () -> ()
    %cst_19 = arith.constant dense<0.000000e+00> : vector<8x8x8xf32>
    %37 = tpu.matmul %35, %36, %cst_19 {dimension_numbers = #tpu.dot_dimension_numbers<[2], [2], [1], [1], [0, 0, 0, 1, 1, 1], [0], [0]>} : vector<8x8x4xf32>, vector<8x8x4xf32>, vector<8x8x8xf32> -> vector<8x8x8xf32>
    "tpu.trace_stop"() : () -> ()
    %cst_20 = arith.constant 5.000000e-01 : f32
    %38 = vector.broadcast %cst_20 : f32 to vector<8x8x8xf32>
    %39 = arith.mulf %37, %38 : vector<8x8x8xf32>
    %cst_21 = arith.constant dense<0xFF800000> : vector<8x8xf32>
    %40 = vector.multi_reduction <maximumf>, %39, %cst_21 [2] : vector<8x8x8xf32> to vector<8x8xf32>
    %41 = vector.shape_cast %40 : vector<8x8xf32> to vector<8x8x1xf32>
    %42 = vector.broadcast %41 : vector<8x8x1xf32> to vector<8x8x8xf32>
    %43 = arith.subf %39, %42 : vector<8x8x8xf32>
    %44 = math.exp %43 : vector<8x8x8xf32>
    %cst_22 = arith.constant dense<0.000000e+00> : vector<8x8xf32>
    %45 = vector.multi_reduction <add>, %44, %cst_22 [2] : vector<8x8x8xf32> to vector<8x8xf32>
    %46 = vector.shape_cast %45 : vector<8x8xf32> to vector<8x8x1xf32>
    %47 = vector.broadcast %46 : vector<8x8x1xf32> to vector<8x8x8xf32>
    %48 = arith.divf %44, %47 : vector<8x8x8xf32>
    %c0_23 = arith.constant 0 : index
    %c0_24 = arith.constant 0 : index
    %c0_25 = arith.constant 0 : index
    %49 = vector.load %arg6[%c0_23, %c0_24, %c0_25] : memref<3x8x8xf32, #tpu.memory_space<vmem>>, vector<1x8x8xf32>
    %50 = vector.shape_cast %49 : vector<1x8x8xf32> to vector<8x8xf32>
    %51 = vector.shape_cast %50 : vector<8x8xf32> to vector<1x8x8xf32>
    %52 = vector.broadcast %51 : vector<1x8x8xf32> to vector<8x8x8xf32>
    %53 = arith.mulf %48, %52 : vector<8x8x8xf32>
    %54 = vector.extract_strided_slice %33 {offsets = [0, 0], sizes = [64, 32], strides = [1, 1]} : vector<64x96xf32> to vector<64x32xf32>
    %55 = vector.shape_cast %54 : vector<64x32xf32> to vector<8x8x32xf32>
    "tpu.trace_start"() <{level = 10 : i32, message = "bij,bjk->bik"}> : () -> ()
    %cst_26 = arith.constant dense<0.000000e+00> : vector<8x8x32xf32>
    %56 = tpu.matmul %53, %55, %cst_26 {dimension_numbers = #tpu.dot_dimension_numbers<[2], [1], [1], [2], [0, 0, 0, 1, 1, 2], [0], [0]>} : vector<8x8x8xf32>, vector<8x8x32xf32>, vector<8x8x32xf32> -> vector<8x8x32xf32>
    "tpu.trace_stop"() : () -> ()
    %57 = arith.addf %34, %56 : vector<8x8x32xf32>
    %58 = vector.extract_strided_slice %31 {offsets = [0, 0, 4], sizes = [8, 8, 4], strides = [1, 1, 1]} : vector<8x8x24xf32> to vector<8x8x4xf32>
    %59 = vector.extract_strided_slice %31 {offsets = [0, 0, 16], sizes = [8, 8, 4], strides = [1, 1, 1]} : vector<8x8x24xf32> to vector<8x8x4xf32>
    "tpu.trace_start"() <{level = 10 : i32, message = "bid,bjd->bij"}> : () -> ()
    %cst_27 = arith.constant dense<0.000000e+00> : vector<8x8x8xf32>
    %60 = tpu.matmul %58, %59, %cst_27 {dimension_numbers = #tpu.dot_dimension_numbers<[2], [2], [1], [1], [0, 0, 0, 1, 1, 1], [0], [0]>} : vector<8x8x4xf32>, vector<8x8x4xf32>, vector<8x8x8xf32> -> vector<8x8x8xf32>
    "tpu.trace_stop"() : () -> ()
    %cst_28 = arith.constant 5.000000e-01 : f32
    %61 = vector.broadcast %cst_28 : f32 to vector<8x8x8xf32>
    %62 = arith.mulf %60, %61 : vector<8x8x8xf32>
    %cst_29 = arith.constant dense<0xFF800000> : vector<8x8xf32>
    %63 = vector.multi_reduction <maximumf>, %62, %cst_29 [2] : vector<8x8x8xf32> to vector<8x8xf32>
    %64 = vector.shape_cast %63 : vector<8x8xf32> to vector<8x8x1xf32>
    %65 = vector.broadcast %64 : vector<8x8x1xf32> to vector<8x8x8xf32>
    %66 = arith.subf %62, %65 : vector<8x8x8xf32>
    %67 = math.exp %66 : vector<8x8x8xf32>
    %cst_30 = arith.constant dense<0.000000e+00> : vector<8x8xf32>
    %68 = vector.multi_reduction <add>, %67, %cst_30 [2] : vector<8x8x8xf32> to vector<8x8xf32>
    %69 = vector.shape_cast %68 : vector<8x8xf32> to vector<8x8x1xf32>
    %70 = vector.broadcast %69 : vector<8x8x1xf32> to vector<8x8x8xf32>
    %71 = arith.divf %67, %70 : vector<8x8x8xf32>
    %c1 = arith.constant 1 : index
    %c0_31 = arith.constant 0 : index
    %c0_32 = arith.constant 0 : index
    %72 = vector.load %arg6[%c1, %c0_31, %c0_32] : memref<3x8x8xf32, #tpu.memory_space<vmem>>, vector<1x8x8xf32>
    %73 = vector.shape_cast %72 : vector<1x8x8xf32> to vector<8x8xf32>
    %74 = vector.shape_cast %73 : vector<8x8xf32> to vector<1x8x8xf32>
    %75 = vector.broadcast %74 : vector<1x8x8xf32> to vector<8x8x8xf32>
    %76 = arith.mulf %71, %75 : vector<8x8x8xf32>
    %77 = vector.extract_strided_slice %33 {offsets = [0, 32], sizes = [64, 32], strides = [1, 1]} : vector<64x96xf32> to vector<64x32xf32>
    %78 = vector.shape_cast %77 : vector<64x32xf32> to vector<8x8x32xf32>
    "tpu.trace_start"() <{level = 10 : i32, message = "bij,bjk->bik"}> : () -> ()
    %cst_33 = arith.constant dense<0.000000e+00> : vector<8x8x32xf32>
    %79 = tpu.matmul %76, %78, %cst_33 {dimension_numbers = #tpu.dot_dimension_numbers<[2], [1], [1], [2], [0, 0, 0, 1, 1, 2], [0], [0]>} : vector<8x8x8xf32>, vector<8x8x32xf32>, vector<8x8x32xf32> -> vector<8x8x32xf32>
    "tpu.trace_stop"() : () -> ()
    %80 = arith.addf %57, %79 : vector<8x8x32xf32>
    %81 = vector.extract_strided_slice %31 {offsets = [0, 0, 8], sizes = [8, 8, 4], strides = [1, 1, 1]} : vector<8x8x24xf32> to vector<8x8x4xf32>
    %82 = vector.extract_strided_slice %31 {offsets = [0, 0, 20], sizes = [8, 8, 4], strides = [1, 1, 1]} : vector<8x8x24xf32> to vector<8x8x4xf32>
    "tpu.trace_start"() <{level = 10 : i32, message = "bid,bjd->bij"}> : () -> ()
    %cst_34 = arith.constant dense<0.000000e+00> : vector<8x8x8xf32>
    %83 = tpu.matmul %81, %82, %cst_34 {dimension_numbers = #tpu.dot_dimension_numbers<[2], [2], [1], [1], [0, 0, 0, 1, 1, 1], [0], [0]>} : vector<8x8x4xf32>, vector<8x8x4xf32>, vector<8x8x8xf32> -> vector<8x8x8xf32>
    "tpu.trace_stop"() : () -> ()
    %cst_35 = arith.constant 5.000000e-01 : f32
    %84 = vector.broadcast %cst_35 : f32 to vector<8x8x8xf32>
    %85 = arith.mulf %83, %84 : vector<8x8x8xf32>
    %cst_36 = arith.constant dense<0xFF800000> : vector<8x8xf32>
    %86 = vector.multi_reduction <maximumf>, %85, %cst_36 [2] : vector<8x8x8xf32> to vector<8x8xf32>
    %87 = vector.shape_cast %86 : vector<8x8xf32> to vector<8x8x1xf32>
    %88 = vector.broadcast %87 : vector<8x8x1xf32> to vector<8x8x8xf32>
    %89 = arith.subf %85, %88 : vector<8x8x8xf32>
    %90 = math.exp %89 : vector<8x8x8xf32>
    %cst_37 = arith.constant dense<0.000000e+00> : vector<8x8xf32>
    %91 = vector.multi_reduction <add>, %90, %cst_37 [2] : vector<8x8x8xf32> to vector<8x8xf32>
    %92 = vector.shape_cast %91 : vector<8x8xf32> to vector<8x8x1xf32>
    %93 = vector.broadcast %92 : vector<8x8x1xf32> to vector<8x8x8xf32>
    %94 = arith.divf %90, %93 : vector<8x8x8xf32>
    %c2 = arith.constant 2 : index
    %c0_38 = arith.constant 0 : index
    %c0_39 = arith.constant 0 : index
    %95 = vector.load %arg6[%c2, %c0_38, %c0_39] : memref<3x8x8xf32, #tpu.memory_space<vmem>>, vector<1x8x8xf32>
    %96 = vector.shape_cast %95 : vector<1x8x8xf32> to vector<8x8xf32>
    %97 = vector.shape_cast %96 : vector<8x8xf32> to vector<1x8x8xf32>
    %98 = vector.broadcast %97 : vector<1x8x8xf32> to vector<8x8x8xf32>
    %99 = arith.mulf %94, %98 : vector<8x8x8xf32>
    %100 = vector.extract_strided_slice %33 {offsets = [0, 64], sizes = [64, 32], strides = [1, 1]} : vector<64x96xf32> to vector<64x32xf32>
    %101 = vector.shape_cast %100 : vector<64x32xf32> to vector<8x8x32xf32>
    "tpu.trace_start"() <{level = 10 : i32, message = "bij,bjk->bik"}> : () -> ()
    %cst_40 = arith.constant dense<0.000000e+00> : vector<8x8x32xf32>
    %102 = tpu.matmul %99, %101, %cst_40 {dimension_numbers = #tpu.dot_dimension_numbers<[2], [1], [1], [2], [0, 0, 0, 1, 1, 2], [0], [0]>} : vector<8x8x8xf32>, vector<8x8x32xf32>, vector<8x8x32xf32> -> vector<8x8x32xf32>
    "tpu.trace_stop"() : () -> ()
    %103 = arith.addf %80, %102 : vector<8x8x32xf32>
    %104 = vector.shape_cast %103 : vector<8x8x32xf32> to vector<64x32xf32>
    %c0_41 = arith.constant 0 : index
    %c0_42 = arith.constant 0 : index
    %105 = vector.load %arg8[%c0_41, %c0_42] : memref<1x32xf32, #tpu.memory_space<vmem>>, vector<1x32xf32>
    %106 = vector.broadcast %105 : vector<1x32xf32> to vector<64x32xf32>
    %107 = arith.addf %104, %106 : vector<64x32xf32>
    %108 = arith.addf %107, %1 : vector<64x32xf32>
    %cst_43 = arith.constant 0.000000e+00 : f32
    %109 = vector.broadcast %cst_43 : f32 to vector<64x32xf32>
    %110 = arith.maximumf %108, %109 : vector<64x32xf32>
    %c0_44 = arith.constant 0 : index
    %c0_45 = arith.constant 0 : index
    %111 = vector.load %arg9[%c0_44, %c0_45] : memref<64x32xf32, #tpu.memory_space<vmem>>, vector<64x32xf32>
    tpu.vector_store %arg9[%c0_44, %c0_45], %110 {strides = array<i32>} : memref<64x32xf32, #tpu.memory_space<vmem>>, vector<64x32xf32>,
    return
  }
  func.func @transform_0(%arg0: i32) -> (i32, i32, i32) {
    %c0_i32 = arith.constant 0 : i32
    %c0_i32_0 = arith.constant 0 : i32
    %c0_i32_1 = arith.constant 0 : i32
    return %arg0, %c0_i32, %c0_i32_0 : i32, i32, i32
  }
  func.func @transform_1(%arg0: i32) -> (i32, i32) {
    %c0_i32 = arith.constant 0 : i32
    %c0_i32_0 = arith.constant 0 : i32
    %c0_i32_1 = arith.constant 0 : i32
    return %c0_i32, %c0_i32_0 : i32, i32
  }
  func.func @transform_2(%arg0: i32) -> (i32, i32) {
    %c0_i32 = arith.constant 0 : i32
    %c0_i32_0 = arith.constant 0 : i32
    %c0_i32_1 = arith.constant 0 : i32
    return %c0_i32, %c0_i32_0 : i32, i32
  }
  func.func @transform_3(%arg0: i32) -> (i32, i32) {
    %c0_i32 = arith.constant 0 : i32
    %c0_i32_0 = arith.constant 0 : i32
    %c0_i32_1 = arith.constant 0 : i32
    return %c0_i32, %c0_i32_0 : i32, i32
  }
  func.func @transform_4(%arg0: i32) -> (i32, i32) {
    %c0_i32 = arith.constant 0 : i32
    %c0_i32_0 = arith.constant 0 : i32
    %c0_i32_1 = arith.constant 0 : i32
    return %c0_i32, %c0_i32_0 : i32, i32
  }
  func.func @transform_5(%arg0: i32) -> (i32, i32, i32) {
    %c0_i32 = arith.constant 0 : i32
    %c0_i32_0 = arith.constant 0 : i32
    %c0_i32_1 = arith.constant 0 : i32
    %c0_i32_2 = arith.constant 0 : i32
    return %c0_i32, %c0_i32_0, %c0_i32_1 : i32, i32, i32
  }
  func.func @transform_6(%arg0: i32) -> (i32, i32) {
    %c0_i32 = arith.constant 0 : i32
    %c0_i32_0 = arith.constant 0 : i32
    %c0_i32_1 = arith.constant 0 : i32
    return %c0_i32, %c0_i32_0 : i32, i32
  }
  func.func @transform_7(%arg0: i32) -> (i32, i32) {
    %c0_i32 = arith.constant 0 : i32
    %c0_i32_0 = arith.constant 0 : i32
    %c0_i32_1 = arith.constant 0 : i32
    return %c0_i32, %c0_i32_0 : i32, i32
  }
  func.func @transform_8(%arg0: i32) -> (i32, i32) {
    %c0_i32 = arith.constant 0 : i32
    %c0_i32_0 = arith.constant 0 : i32
    return %arg0, %c0_i32 : i32, i32
  }
}

</mosaic_0001>

<bundles_post_ra>
// kernel: tpu_custom_call.1
= control target key start
LH: loop header
LB: loop body
LE: loop exit
PB: predicated region body
PF: predicated region fallthrough
CT: control target
= control target key end

     0   :  { %13 = vsyncpa [#allocation3], 0  ;;  %s4352_s0 = inlined_call_operand.hbm [shape: f32[16,8,32], index: 0, kind: input, shape index: {}]   ;;  %s4353_s1 = inlined_call_operand.vmem [shape: f32[1,32], index: 1, kind: input, shape index: {}]   ;;  %s4354_s2 = inlined_call_operand.vmem [shape: f32[1,32], index: 2, kind: input, shape index: {}]   ;;  %s4355_s3 = inlined_call_operand.vmem [shape: f32[32,24], index: 3, kind: input, shape index: {}]   ;;  %s4356_s4 = inlined_call_operand.vmem [shape: f32[1,24], index: 4, kind: input, shape index: {}]   ;;  %s4357_s5 = inlined_call_operand.vmem [shape: f32[3,8,8], index: 5, kind: input, shape index: {}]   ;;  %s4358_s6 = inlined_call_operand.vmem [shape: f32[32,96], index: 6, kind: input, shape index: {}]   ;;  %s4359_s7 = inlined_call_operand.vmem [shape: f32[1,32], index: 7, kind: input, shape index: {}]   ;;  %s4360_s8 = inlined_call_operand.vmem [shape: f32[128,32], index: 8, kind: output, shape index: {}]  }
   0x1   :  { %15 = vsyncpa [#allocation3 + $0x1], 0  ;;  %s3158_s27 = smov 0   ;;  %s3160_s28 = smov 0  }
   0x2   :  { %s3162_s29 = smov 0   ;;  %s3164_s30 = smov 0  }
   0x3 LB: > { %s2718_s9 = sadd.s32 4294967295, %s3101_s30   ;;  %s3178_s10 = sadd.s32 1, %s3101_s30   ;;  %s3101_s30 = sphi %s3164_s30, %s4395_s30   ;;  %s3097_s29 = sphi %s3162_s29, %s4394_s29   ;;  %s3093_s28 = sphi %s3160_s28, %s4393_s28   ;;  %s3089_s27 = sphi %s3158_s27, %s4392_s27  }
   0x4   : > { %s25_s11 = ssub.s32 %s3101_s30, %s3178_s10  ;;  %s28_s12 = sadd.s32 1, %s3097_s29 }
   0x5   : > { %p26_p0 = scmp.eq.s32.totalorder %s25_s11, 0  ;;  %p35_p1 = scmp.ne.s32.totalorder %s3097_s29, %s3093_s28 }
   0x6   : > { %p36_p2 = scmp.eq.s32.totalorder %s3101_s30, 0  ;;  %p41_p3 = scmp.ne.s32.totalorder %s3093_s28, %s3089_s27 }
   0x7   : > { %s3188_s13 = scalar_select %p26_p0, %s3097_s29, %s28_s12  }
   0x8   : > { %p3190_p4 = por %p36_p2, %p35_p1  ;;  %p42_p5 = scmp.eq.s32.totalorder %s2718_s9, 0 }
   0x9   : > { %p2828_p6 = scmp.lt.s32.totalorder %s3101_s30, 2  ;;  %s259_s16 = sand.u32 1, %s3097_s29  }
   0xa   : > { %p3197_p7 = por %p42_p5, %p41_p3  ;;  %s2722_s17 = sshll.u32 %s259_s16, 6 }
   0xb   : > { %s2821_s18 = sshll.u32 %s3101_s30, 6  ;;  %s263_s22 = scalar_lea.vmem [#allocation2], %s2722_s17 }
   0xc   : > { %s268_s21 = scalar_lea.hbm %s4352_s0, %s2821_s18  ;;  %s271_s23 = sshll.u32 %s263_s22, 4  ;;  %s272_s23 = int_to_ptr.vmem [resolvable:$true] %s271_s23 }
   0xd   : > { %s269_s24 = sshll.u32 %s268_s21, 4  ;;  %p3208_p8 = pnand %p2828_p6, %p3190_p4  ;;  %s270_s24 = int_to_ptr.hbm [resolvable:$true] %s269_s24 }
   0xe   : > { %p2725_p9 = scmp.ge.s32.totalorder %s3101_s30, 1  ;;  %s260_s26 = scalar_lea.sflag [#allocation3], %s259_s16 }
   0xf   : > { %s3037_s27 = sshra.s32 %s270_s24, 4  ;;  %p3041_p11 = pneg %p3208_p8  ;;  %s3038_s27 = int_to_ptr.hbm [resolvable:$true] %s3037_s27 }
  0x10   : > { %s3039_s11 = scalar_lea.hbm %s3038_s27, 64  ;;  %s3044_s18 = scalar_lea.hbm %s4352_s0, 128 }
  0x11   : > { %p3040_p10 = scmp.ne.s32.totalorder %s3038_s27, %s3039_s11  ;;  %p3045_p0 = scmp.lt.s32.totalorder %s3038_s27, %s4352_s0 }
  0x12   : > { %p3046_p1 = scmp.lt.s32.totalorder %s3044_s18, %s3039_s11 }
  0x13   : > { %p3042_p12 = pnand %p3041_p11, %p3040_p10 }
  0x14   : > { %p3047_p2 = por %p3046_p1, %p3045_p0 }
  0x15   : > { %p3043_p13 = pneg %p3042_p12 }
  0x17   : > { %p3048_p3 = pnand %p3047_p2, %p3043_p13 }
  0x19   : > { %3051 = shalt.err (!%p3048_p3)
}
  0x1a   : > { %s3103_s16 = smov 128   ;;  %s3104_s20 = smov 8  }
  0x1b   : > { %2827 = dma.hbm_to_vmem [thread:$0]  (!%p3208_p8), %s270_s24, 1024, %s272_s23, %s260_s26, %s3103_s16, %s3103_s16, %s3104_s20  }
  0x1c   : > { %p279_p4 = scmp.lt.s32.totalorder %s3101_s30, 3 }
  0x1e   : > { %p280_p5 = pnand %p2725_p9, %p279_p4 }
  0x1f   : > { %s285_s21 = sand.u32 (!%p280_p5), 1, %s3093_s28  }
  0x20   : > { %283 = sbr.rel (%p280_p5) target bundleno = 1583 (0x62f), region = 52  ;;  %s2726_s22 = sshll.u32 (!%p280_p5), %s285_s21, 6 }
  0x21   : > { %s286_s27 = scalar_lea.sflag (!%p280_p5), [#allocation3], %s285_s21  ;;  %s3227_s11 = scalar_lea.vmem (!%p280_p5), [#allocation2], %s2726_s22 }
  0x25   : > { %3084 = dma.done.wait (%p3197_p7), %s286_s27, 1024  }
  0x26   : > { %3086 = vsyncadd (%p3197_p7), %s286_s27, 4294966272  ;;  %vm338_vm0 = vcmask 261120   ;;  %v3234_v0 = vld [vmem:[%s3227_s11 + $0x10] sm:$0xff]  ;;  %v3237_v1 = vld [vmem:[%s3227_s11 + $0x8] sm:$0xff]  ;;  %v3105_v32 = vmov 32.0   ;;  %s3106_s27 = smov 116  }
  0x27   : > { %v3240_v2 = vld [vmem:[%s3227_s11] sm:$0xff]  ;;  %v345_v3 = vsel %vm338_vm0, %v3234_v0, 0.0  ;;  %v342_v4 = vsel %vm338_vm0, %v3237_v1, 0.0  ;;  %v380_v6 = vmul.f32 %v3234_v0, %v3234_v0  ;;  %v379_v7 = vmul.f32 %v3237_v1, %v3237_v1  ;;  %v3258_v12 = vld [vmem:[%s3227_s11 + $0x18] sm:$0xff]  ;;  %v3271_v18 = vld [vmem:[%s3227_s11 + $0x28] sm:$0xff]  ;;  %s3107_s14 = smov 112  }
  0x28   : > { %v339_v5 = vsel %vm338_vm0, %v3240_v2, 0.0  ;;  %346 = vadd.xlane.f32.xlu2 %v345_v3  ;;  %343 = vadd.xlane.f32.xlu1 %v342_v4  ;;  %v378_v8 = vmul.f32 %v3240_v2, %v3240_v2  ;;  %v381_v13 = vmul.f32 %v3258_v12, %v3258_v12  ;;  %v3263_v14 = vld [vmem:[%s3227_s11 + $0x20] sm:$0xff]  ;;  %v348_v17 = vsel %vm338_vm0, %v3258_v12, 0.0  ;;  %v3282_v24 = vld [vmem:[%s3227_s11 + $0x30] sm:$0xff]  ;;  %v3287_v26 = vld [vmem:[%s3227_s11 + $0x38] sm:$0xff]  ;;  %s3108_s19 = smov 124  }
  0x29   : > { %340 = vadd.xlane.f32.xlu0 %v339_v5  ;;  %v392_v9 = vsel %vm338_vm0, %v380_v6, 0.0  ;;  %v389_v10 = vsel %vm338_vm0, %v379_v7, 0.0  ;;  %v351_v16 = vsel %vm338_vm0, %v3263_v14, 0.0  ;;  %v383_v19 = vmul.f32 %v3271_v18, %v3271_v18  ;;  %v565_v41 = vld [vmem:[%s4355_s3 + $0x18] sm:$0xff]  ;;  %v564_v45 = vld [vmem:[%s4355_s3 + $0x10] sm:$0xff]  ;;  %v563_v46 = vld [vmem:[%s4355_s3 + $0x8] sm:$0xff] }
  0x2a   : > { %v386_v11 = vsel %vm338_vm0, %v378_v8, 0.0  ;;  %v395_v15 = vsel %vm338_vm0, %v381_v13, 0.0  ;;  %v382_v20 = vmul.f32 %v3263_v14, %v3263_v14  ;;  %v354_v21 = vsel %vm338_vm0, %v3271_v18, 0.0  ;;  %606 = vmatpush.msra.mxu0 %v565_v41  ;;  %v562_v50 = vld [vmem:[%s4355_s3] sm:$0xff]  ;;  %s3109_s16 = smov 96   ;;  %s3110_s20 = smov 108  }
  0x2b   : > { %v401_v22 = vsel %vm338_vm0, %v383_v19, 0.0  ;;  %v384_v25 = vmul.f32 %v3282_v24, %v3282_v24  ;;  %v360_v28 = vsel %vm338_vm0, %v3287_v26, 0.0  ;;  %v357_v29 = vsel %vm338_vm0, %v3282_v24, 0.0  ;;  %s3111_s21 = smov 120   ;;  %s3112_s24 = smov 64  }
  0x2c   : > { %v398_v23 = vsel %vm338_vm0, %v382_v20, 0.0  ;;  %v385_v30 = vmul.f32 %v3287_v26, %v3287_v26  ;;  %2915 = vrcp.f32 %v3105_v32  ;;  %607 = vmatpush.msra.mxu0 %v564_v45  ;;  %s2727_s12 = sshll.u32 %s2718_s9, 3 }
  0x2d   : > { %v404_v27 = vsel %vm338_vm0, %v384_v25, 0.0  ;;  %p325_p6 = scmp.lt.s32.totalorder %s2727_s12, 15 }
  0x2e   : > { %v407_v31 = vsel %vm338_vm0, %v385_v30, 0.0  ;;  %608 = vmatpush.msra.mxu0 %v563_v46 }
  0x2f   : > { %s4397_s12 = smov (!%p325_p6, %s2727_s12), 15 }
  0x30   : > { %393 = vadd.xlane.f32.xlu2 %v392_v9  ;;  %390 = vadd.xlane.f32.xlu1 %v389_v10 }
  0x31   : > { %387 = vadd.xlane.f32.xlu0 %v386_v11  ;;  %609 = vmatpush.msra.mxu0 %v562_v50 }
  0x32   : > { %v2916_v33 = vpop.eup %2915 }
  0x33   : > { %v364_v34 = vmul.f32 32.0, %v2916_v33  ;;  %vm368_vm1 = vweird.f32 %v2916_v33 }
  0x35   : > { %v365_v35 = vsub.f32 1.0, %v364_v34 }
  0x37   : > { %v366_v36 = vmul.f32 %v2916_v33, %v365_v35 }
  0x38   : > { %396 = vadd.xlane.f32.xlu1 %v395_v15  ;;  %352 = vadd.xlane.f32.xlu2 %v351_v16 }
  0x39   : > { %349 = vadd.xlane.f32.xlu0 %v348_v17  ;;  %v367_v37 = vadd.f32 %v2916_v33, %v366_v36 }
  0x3b   : > { %v3300_v42 = vsel %vm368_vm1, %v2916_v33, %v367_v37 }
  0x40   : > { %355 = vadd.xlane.f32.xlu1 %v354_v21  ;;  %402 = vadd.xlane.f32.xlu2 %v401_v22 }
  0x41   : > { %399 = vadd.xlane.f32.xlu0 %v398_v23 }
  0x48   : > { %405 = vadd.xlane.f32.xlu1 %v404_v27  ;;  %361 = vadd.xlane.f32.xlu2 %v360_v28 }
  0x49   : > { %358 = vadd.xlane.f32.xlu0 %v357_v29 }
  0x51   : > { %408 = vadd.xlane.f32.xlu0 %v407_v31 }
  0x9b   : > { %v347_v38 = vpop.xlane.xlu2 %346  ;;  %v344_v39 = vpop.xlane.xlu1 %343 }
  0x9c   : > { %v341_v40 = vpop.xlane.xlu0 %340  ;;  %v3303_v43 = vmul.f32 %v3300_v42, %v347_v38  ;;  %v3306_v44 = vmul.f32 %v3300_v42, %v344_v39 }
  0x9d   : > { %v3315_v47 = vmul.f32 %v3300_v42, %v341_v40 }
  0x9e   : > { %v428_v48 = vmul.f32 %v3303_v43, %v3303_v43  ;;  %v427_v49 = vmul.f32 %v3306_v44, %v3306_v44 }
  0x9f   : > { %v426_v56 = vmul.f32 %v3315_v47, %v3315_v47 }
  0xa3   : > { %v394_v51 = vpop.xlane.xlu2 %393  ;;  %v391_v52 = vpop.xlane.xlu1 %390 }
  0xa4   : > { %v412_v53 = vmul.f32 %v394_v51, %v3300_v42  ;;  %v411_v54 = vmul.f32 %v391_v52, %v3300_v42  ;;  %v388_v55 = vpop.xlane.xlu0 %387  ;;  %v418_v52 = vsub.f32 %v3240_v2, %v3315_v47 }
  0xa5   : > { %v410_v57 = vmul.f32 %v388_v55, %v3300_v42 }
  0xa6   : > { %v436_v58 = vsub.f32 %v412_v53, %v428_v48  ;;  %v435_v59 = vsub.f32 %v411_v54, %v427_v49  ;;  %v3373_v54 = vld [vmem:[%s4353_s1] ss:$0 sm:$0xff] }
  0xa7   : > { %v434_v60 = vsub.f32 %v410_v57, %v426_v56 }
  0xa8   : > { %v3329_v61 = vadd.f32 1e-05, %v436_v58  ;;  %v443_v62 = vadd.f32 1e-05, %v435_v59 }
  0xa9   : > { %v442_v63 = vadd.f32 1e-05, %v434_v60  ;;  %v3388_v60 = vld [vmem:[%s4354_s2] ss:$0 sm:$0xff] }
  0xaa   : > { %2917 = vrsqrt.f32 %v3329_v61  ;;  %vm466_vm6 = vweird.f32 %v443_v62  ;;  %vm476_vm8 = vweird.f32 %v3329_v61 }
  0xab   : > { %2919 = vrsqrt.f32 %v443_v62  ;;  %v397_v3 = vpop.xlane.xlu1 %396  ;;  %v353_v4 = vpop.xlane.xlu2 %352  ;;  %vm456_vm4 = vweird.f32 %v442_v63 }
  0xac   : > { %2921 = vrsqrt.f32 %v442_v63  ;;  %v350_v5 = vpop.xlane.xlu0 %349  ;;  %v413_v6 = vmul.f32 %v397_v3, %v3300_v42  ;;  %v3341_v10 = vmul.f32 %v3300_v42, %v353_v4 }
  0xad   : > { %v3334_v7 = vmul.f32 %v3300_v42, %v350_v5  ;;  %v419_v5 = vsub.f32 %v3237_v1, %v3306_v44 }
  0xae   : > { %v430_v25 = vmul.f32 %v3341_v10, %v3341_v10 }
  0xaf   : > { %v429_v8 = vmul.f32 %v3334_v7, %v3334_v7 }
  0xb0   : > { %v3338_v9 = vpop.eup %2917 }
  0xb1   : > { %v2920_v11 = vpop.eup %2919  ;;  %v437_v13 = vsub.f32 %v413_v6, %v429_v8  ;;  %v471_v22 = vmul.f32 %v3338_v9, %v3329_v61  ;;  %vm477_vm9 = vweird.f32 %v3338_v9 }
  0xb2   : > { %v2922_v15 = vpop.eup %2921  ;;  %v461_v16 = vmul.f32 %v2920_v11, %v443_v62  ;;  %vm467_vm3 = vweird.f32 %v2920_v11  ;;  %vm478_vm10 = vmor %vm476_vm8, %vm477_vm9 }
  0xb3   : > { %v451_v17 = vmul.f32 %v2922_v15, %v442_v63  ;;  %v3343_v19 = vadd.f32 1e-05, %v437_v13  ;;  %v356_v20 = vpop.xlane.xlu1 %355  ;;  %v403_v21 = vpop.xlane.xlu2 %402  ;;  %v472_v35 = vmul.f32 %v3338_v9, %v471_v22  ;;  %vm457_vm2 = vweird.f32 %v2922_v15  ;;  %vm3378_vm7 = vmor %vm466_vm6, %vm467_vm3 }
  0xb4   : > { %v462_v23 = vmul.f32 %v2920_v11, %v461_v16  ;;  %v3350_v27 = vmul.f32 %v3300_v42, %v356_v20  ;;  %v400_v28 = vpop.xlane.xlu0 %399  ;;  %v415_v33 = vmul.f32 %v403_v21, %v3300_v42  ;;  %vm458_vm5 = vmor %vm456_vm4, %vm457_vm2 }
  0xb5   : > { %v452_v29 = vmul.f32 %v2922_v15, %v451_v17  ;;  %2923 = vrsqrt.f32 %v3343_v19  ;;  %v414_v32 = vmul.f32 %v400_v28, %v3300_v42  ;;  %v473_v46 = vmul.f32 0.5, %v472_v35 }
  0xb6   : > { %v463_v30 = vmul.f32 0.5, %v462_v23  ;;  %v431_v31 = vmul.f32 %v3350_v27, %v3350_v27  ;;  %vm486_vm11 = vweird.f32 %v3343_v19 }
  0xb7   : > { %v453_v34 = vmul.f32 0.5, %v452_v29  ;;  %v438_v37 = vsub.f32 %v414_v32, %v430_v25  ;;  %v474_v62 = vsub.f32 1.5, %v473_v46  ;;  %v420_v32 = vsub.f32 %v3234_v0, %v3303_v43 }
  0xb8   : > { %v464_v36 = vsub.f32 1.5, %v463_v30  ;;  %v439_v40 = vsub.f32 %v415_v33, %v431_v31  ;;  %v421_v46 = vsub.f32 %v3258_v12, %v3334_v7 }
  0xb9   : > { %v454_v38 = vsub.f32 1.5, %v453_v34  ;;  %v3358_v39 = vadd.f32 1e-05, %v438_v37  ;;  %v475_v20 = vmul.f32 %v3338_v9, %v474_v62 }
  0xba   : > { %v465_v48 = vmul.f32 %v2920_v11, %v464_v36  ;;  %v3375_v55 = vadd.f32 1e-05, %v439_v40 }
  0xbb   : > { %v3360_v41 = vpop.eup %2923  ;;  %v455_v45 = vmul.f32 %v2922_v15, %v454_v38  ;;  %2925 = vrsqrt.f32 %v3358_v39  ;;  %v406_v51 = vpop.xlane.xlu1 %405  ;;  %v479_v31 = vsel %vm478_vm10, %v3338_v9, %v475_v20  ;;  %vm496_vm14 = vweird.f32 %v3358_v39 }
  0xbc   : > { %v481_v49 = vmul.f32 %v3360_v41, %v3343_v19  ;;  %v359_v50 = vpop.xlane.xlu0 %358  ;;  %v416_v58 = vmul.f32 %v406_v51, %v3300_v42  ;;  %v362_v3 = vpop.xlane.xlu2 %361  ;;  %v469_v4 = vsel %vm3378_vm7, %v2920_v11, %v465_v48  ;;  %2927 = vrsqrt.f32 %v3375_v55 }
  0xbd   : > { %v3368_v53 = vmul.f32 %v3300_v42, %v359_v50  ;;  %v459_v56 = vsel %vm458_vm5, %v2922_v15, %v455_v45  ;;  %v3400_v16 = vmul.f32 %v3300_v42, %v362_v3  ;;  %v531_v17 = vmul.f32 %v469_v4, %v419_v5 }
  0xbe   : > { %v530_v59 = vmul.f32 %v459_v56, %v418_v52  ;;  %v482_v63 = vmul.f32 %v3360_v41, %v481_v49  ;;  %vm487_vm12 = vweird.f32 %v3360_v41  ;;  %vm506_vm2 = vweird.f32 %v3375_v55 }
  0xbf   : > { %v432_v47 = vmul.f32 %v3368_v53, %v3368_v53  ;;  %v433_v22 = vmul.f32 %v3400_v16, %v3400_v16  ;;  %v543_v25 = vmul.f32 %v3373_v54, %v531_v17  ;;  %vm488_vm13 = vmor %vm486_vm11, %vm487_vm12  ;;  %v423_v4 = vsub.f32 %v3271_v18, %v3350_v27 }
  0xc0   : > { %v542_v6 = vmul.f32 %v3373_v54, %v530_v59  ;;  %v483_v11 = vmul.f32 0.5, %v482_v63  ;;  %v424_v20 = vsub.f32 %v3282_v24, %v3368_v53  ;;  %vm707_vm11 = vcmask 31744  }
  0xc1   : > { %v2926_v8 = vpop.eup %2925  ;;  %v440_v13 = vsub.f32 %v416_v58, %v432_v47  ;;  %v555_v34 = vadd.f32 %v3388_v60, %v543_v25  ;;  %vm929_vm12 = vcmask 64512  }
  0xc2   : > { %v554_v15 = vadd.f32 %v3388_v60, %v542_v6  ;;  %v491_v44 = vmul.f32 %v2926_v8, %v3358_v39  ;;  %v2928_v28 = vpop.eup %2927  ;;  %v484_v29 = vsub.f32 1.5, %v483_v11  ;;  %vm497_vm15 = vweird.f32 %v2926_v8 }
  0xc3   : > { %v3406_v61 = vadd.f32 1e-05, %v440_v13  ;;  %v501_v37 = vmul.f32 %v2928_v28, %v3375_v55  ;;  %vm498_vm1 = vmor %vm496_vm14, %vm497_vm15  ;;  %v422_v39 = vsub.f32 %v3263_v14, %v3341_v10  ;;  %vm507_vm3 = vweird.f32 %v2928_v28 }
  0xc4   : > { %v409_v21 = vpop.xlane.xlu0 %408  ;;  %2729 = vmatmul.msk.f32.vlgmr.msra.gmra.mxu0 %vm338_vm0, %v554_v15  ;;  %v492_v30 = vmul.f32 %v2926_v8, %v491_v44  ;;  %v485_v35 = vmul.f32 %v3360_v41, %v484_v29  ;;  %vm508_vm4 = vmor %vm506_vm2, %vm507_vm3 }
  0xc5   : > { %v417_v23 = vmul.f32 %v409_v21, %v3300_v42  ;;  %2929 = vrsqrt.f32 %v3406_v61  ;;  %v532_v42 = vmul.f32 %v479_v31, %v420_v32  ;;  %v502_v40 = vmul.f32 %v2928_v28, %v501_v37  ;;  %v2913_v32 = vld [vmem:[%s4356_s4] ss:$0 sm:$0xff] }
  0xc6   : > { %v493_v36 = vmul.f32 0.5, %v492_v30  ;;  %v489_v19 = vsel %vm488_vm13, %v3360_v41, %v485_v35  ;;  %vm516_vm5 = vweird.f32 %v3406_v61  ;;  %v636_v35 = vld [vmem:[%s4358_s6 + $0x8] sm:$0xff] }
  0xc7   : > { %v441_v33 = vsub.f32 %v417_v23, %v433_v22  ;;  %v544_v43 = vmul.f32 %v3373_v54, %v532_v42  ;;  %v533_v48 = vmul.f32 %v489_v19, %v421_v46  ;;  %v503_v51 = vmul.f32 0.5, %v502_v40 }
  0xc8   : > { %v494_v38 = vsub.f32 1.5, %v493_v36  ;;  %v425_v23 = vsub.f32 %v3287_v26, %v3400_v16  ;;  %v635_v36 = vld [vmem:[%s4358_s6] sm:$0xff] }
  0xc9   : > { %v449_v9 = vadd.f32 1e-05, %v441_v33  ;;  %v556_v49 = vadd.f32 %v3388_v60, %v544_v43  ;;  %v545_v41 = vmul.f32 %v3373_v54, %v533_v48  ;;  %v504_v56 = vsub.f32 1.5, %v503_v51 }
  0xca   : > { %v495_v50 = vmul.f32 %v2926_v8, %v494_v38 }
  0xcb   : > { %v2930_v45 = vpop.eup %2929  ;;  %2931 = vrsqrt.f32 %v449_v9  ;;  %v557_v58 = vadd.f32 %v3388_v60, %v545_v41  ;;  %v505_v62 = vmul.f32 %v2928_v28, %v504_v56  ;;  %vm526_vm8 = vweird.f32 %v449_v9 }
  0xcc   : > { %2730 = vmatmul.msk.f32.gmra.mxu0 %vm338_vm0, %v555_v34  ;;  %v511_v52 = vmul.f32 %v2930_v45, %v3406_v61  ;;  %v499_v47 = vsel %vm498_vm1, %v2926_v8, %v495_v50  ;;  %vm517_vm6 = vweird.f32 %v2930_v45 }
  0xcd   : > { %v534_v59 = vmul.f32 %v499_v47, %v422_v39  ;;  %v509_v10 = vsel %vm508_vm4, %v2928_v28, %v505_v62  ;;  %vm518_vm7 = vmor %vm516_vm5, %vm517_vm6 }
  0xce   : > { %v512_v57 = vmul.f32 %v2930_v45, %v511_v52  ;;  %v535_v13 = vmul.f32 %v509_v10, %v423_v4 }
  0xcf   : > { %v546_v5 = vmul.f32 %v3373_v54, %v534_v59 }
  0xd0   : > { %v513_v63 = vmul.f32 0.5, %v512_v57  ;;  %v547_v27 = vmul.f32 %v3373_v54, %v535_v13 }
  0xd1   : > { %v2932_v7 = vpop.eup %2931  ;;  %v558_v55 = vadd.f32 %v3388_v60, %v546_v5 }
  0xd2   : > { %v521_v3 = vmul.f32 %v2932_v7, %v449_v9  ;;  %v514_v6 = vsub.f32 1.5, %v513_v63  ;;  %vm527_vm9 = vweird.f32 %v2932_v7  ;;  %v559_v21 = vadd.f32 %v3388_v60, %v547_v27 }
  0xd3   : > { %vm528_vm10 = vmor %vm526_vm8, %vm527_vm9 }
  0xd4   : > { %2731 = vmatmul.msk.f32.gmra.mxu0 %vm338_vm0, %v556_v49  ;;  %v522_v8 = vmul.f32 %v2932_v7, %v521_v3  ;;  %v515_v15 = vmul.f32 %v2930_v45, %v514_v6 }
  0xd6   : > { %v523_v17 = vmul.f32 0.5, %v522_v8  ;;  %v519_v44 = vsel %vm518_vm7, %v2930_v45, %v515_v15 }
  0xd7   : > { %v536_v61 = vmul.f32 %v519_v44, %v424_v20 }
  0xd8   : > { %v524_v11 = vsub.f32 1.5, %v523_v17 }
  0xd9   : > { %v548_v25 = vmul.f32 %v3373_v54, %v536_v61 }
  0xda   : > { %v525_v22 = vmul.f32 %v2932_v7, %v524_v11 }
  0xdb   : > { %v560_v53 = vadd.f32 %v3388_v60, %v548_v25 }
  0xdc   : > { %2732 = vmatmul.msk.f32.gmra.mxu0 %vm338_vm0, %v557_v58  ;;  %v529_v28 = vsel %vm528_vm10, %v2932_v7, %v525_v22 }
  0xdd   : > { %v537_v29 = vmul.f32 %v529_v28, %v425_v23 }
  0xdf   : > { %v549_v30 = vmul.f32 %v3373_v54, %v537_v29  ;;  %v638_v54 = vld [vmem:[%s4358_s6 + $0x18] sm:$0xff] }
  0xe0   : > { %675 = vmatpush.msra.mxu1 %v638_v54 }
  0xe1   : > { %v561_v31 = vadd.f32 %v3388_v60, %v549_v30  ;;  %v637_v60 = vld [vmem:[%s4358_s6 + $0x10] sm:$0xff] }
  0xe2   : > { %676 = vmatpush.msra.mxu1 %v637_v60 }
  0xe4   : > { %2733 = vmatmul.msk.f32.gmra.mxu0 %vm338_vm0, %v558_v55  ;;  %677 = vmatpush.msra.mxu1 %v636_v35 }
  0xe6   : > { %678 = vmatpush.msra.mxu1 %v635_v36 }
  0xe7   : > { %2737 = vmatmul.msk.f32.vlgmr.msra.gmra.mxu1 %vm338_vm0, %v3240_v2 }
  0xec   : > { %2734 = vmatmul.msk.f32.gmra.mxu0 %vm338_vm0, %v559_v21 }
  0xef   : > { %2738 = vmatmul.msk.f32.gmra.mxu1 %vm338_vm0, %v3237_v1 }
  0xf4   : > { %2735 = vmatmul.msk.f32.gmra.mxu0 %vm338_vm0, %v560_v53 }
  0xf7   : > { %2739 = vmatmul.msk.f32.gmra.mxu1 %vm338_vm0, %v3234_v0 }
  0xfc   : > { %2736 = vmatmul.msk.f32.gmra.mxu0 %vm338_vm0, %v561_v31 }
  0xff   : > { %2740 = vmatmul.msk.f32.gmra.mxu1 %vm338_vm0, %v3258_v12 }
 0x107   : > { %2741 = vmatmul.msk.f32.gmra.mxu1 %vm338_vm0, %v3263_v14 }
 0x10f   : > { %2742 = vmatmul.msk.f32.gmra.mxu1 %vm338_vm0, %v3271_v18 }
 0x117   : > { %2743 = vmatmul.msk.f32.gmra.mxu1 %vm338_vm0, %v3282_v24 }
 0x11f   : > { %2744 = vmatmul.msk.f32.gmra.mxu1 %vm338_vm0, %v3287_v26 }
 0x141   : > { %v611_v33 = vpop.f32.mrf.mxu0 }
 0x142   : > { %v3458_v16 = vadd.f32 %v2913_v32, %v611_v33 }
 0x144   : > { %705 = vrot.lane.b32.xlu1 %v3458_v16, %s3106_s27 }
 0x149   : > { %v614_v34 = vpop.f32.mrf.mxu0 }
 0x14a   : > { %v3462_v42 = vadd.f32 %v2913_v32, %v614_v34 }
 0x14c   : > { %733 = vrot.lane.b32.xlu2 %v3462_v42, %s3106_s27 }
 0x151   : > { %v617_v37 = vpop.f32.mrf.mxu0 }
 0x152   : > { %v3478_v9 = vadd.f32 %v2913_v32, %v617_v37 }
 0x154   : > { %760 = vrot.lane.b32.xlu0 %v3478_v9, %s3106_s27 }
 0x159   : > { %v620_v43 = vpop.f32.mrf.mxu0 }
 0x15a   : > { %v3484_v19 = vadd.f32 %v2913_v32, %v620_v43 }
 0x15c   : > { %787 = vrot.lane.b32.xlu2 %v3484_v19, %s3106_s27 }
 0x161   : > { %v623_v38 = vpop.f32.mrf.mxu0 }
 0x162   : > { %v3490_v40 = vadd.f32 %v2913_v32, %v623_v38 }
 0x164   : > { %814 = vrot.lane.b32.xlu1 %v3490_v40, %s3106_s27  ;;  %v3546_v26 = vpop.f32.mrf.mxu1 }
 0x169   : > { %v626_v2 = vpop.f32.mrf.mxu0 }
 0x16a   : > { %v3496_v45 = vadd.f32 %v2913_v32, %v626_v2 }
 0x16c   : > { %841 = vrot.lane.b32.xlu0 %v3496_v45, %s3106_s27  ;;  %v3549_v51 = vpop.f32.mrf.mxu1 }
 0x16d   : > { %v3554_v52 = vpack.i.bf16 %v3549_v51, %v3546_v26 }
 0x171   : > { %v629_v1 = vpop.f32.mrf.mxu0 }
 0x172   : > { %v3502_v46 = vadd.f32 %v2913_v32, %v629_v1 }
 0x174   : > { %1133 = vrot.lane.b32.xlu0 %v3458_v16, %s3107_s14  ;;  %868 = vrot.lane.b32.xlu2 %v3502_v46, %s3106_s27  ;;  %v3561_v57 = vpop.f32.mrf.mxu1 }
 0x179   : > { %v632_v0 = vpop.f32.mrf.mxu0 }
 0x17a   : > { %v3509_v48 = vadd.f32 %v2913_v32, %v632_v0 }
 0x17c   : > { %1159 = vrot.lane.b32.xlu0 %v3462_v42, %s3108_s19  ;;  %1161 = vrot.lane.b32.xlu2 %v3462_v42, %s3107_s14  ;;  %v3568_v39 = vpop.f32.mrf.mxu1 }
 0x17d   : > { %895 = vrot.lane.b32.xlu1 %v3509_v48, %s3106_s27 }
 0x184   : > { %1187 = vrot.lane.b32.xlu0 %v3478_v9, %s3108_s19  ;;  %1189 = vrot.lane.b32.xlu2 %v3478_v9, %s3107_s14  ;;  %v3571_v63 = vpop.f32.mrf.mxu1 }
 0x185   : > { %1131 = vrot.lane.b32.xlu1 %v3458_v16, %s3108_s19 }
 0x18c   : > { %1273 = vrot.lane.b32.xlu0 %v3496_v45, %s3107_s14  ;;  %1215 = vrot.lane.b32.xlu2 %v3484_v19, %s3108_s19  ;;  %v3577_v5 = vpop.f32.mrf.mxu1 }
 0x18d   : > { %1217 = vrot.lane.b32.xlu1 %v3484_v19, %s3107_s14  ;;  %v3582_v6 = vpack.i.bf16 %v3577_v5, %v3571_v63 }
 0x194   : > { %1301 = vrot.lane.b32.xlu0 %v3502_v46, %s3107_s14  ;;  %1243 = vrot.lane.b32.xlu2 %v3490_v40, %s3108_s19 }
 0x195   : > { %1245 = vrot.lane.b32.xlu1 %v3490_v40, %s3107_s14 }
 0x19c   : > { %1327 = vrot.lane.b32.xlu0 %v3509_v48, %s3108_s19  ;;  %1329 = vrot.lane.b32.xlu2 %v3509_v48, %s3107_s14  ;;  %s2728_s14 = sshll.u32 %s4397_s12, 3 }
 0x19d   : > { %1271 = vrot.lane.b32.xlu1 %v3496_v45, %s3108_s19 }
 0x1a4   : > { %2872 = vrot.lane.b32.xlu0 %v3554_v52, %s3109_s16  ;;  %2877 = vrot.lane.b32.xlu2 %v3582_v6, %s3109_s16 }
 0x1a5   : > { %1299 = vrot.lane.b32.xlu1 %v3502_v46, %s3108_s19  ;;  %s4309_s19 = scalar_lea.vmem %s4360_s8, %s2728_s14 }
 0x1a6   : > { %v734_v12 = vpop.permute.xlu2 %733 }
 0x1a7   : > { %2747 = vmatpush.xpose.msk.msra.mxu3 %vm707_vm11, %v734_v12 }
 0x1aa   : > { %2748 = vmatmul.msk.f32.vlgmr.msra.gmra.mxu3 %vm707_vm11, %v3462_v42 }
 0x1b6   : > { %v706_v14 = vpop.permute.xlu1 %705  ;;  %v788_v18 = vpop.permute.xlu2 %787 }
 0x1b7   : > { %2745 = vmatpush.xpose.msk.msra.mxu2 %vm707_vm11, %v706_v14  ;;  %2751 = vmatpush.xpose.msk.msrb.mxu3 %vm707_vm11, %v788_v18 }
 0x1ba   : > { %2746 = vmatmul.msk.f32.vlgmr.msra.gmra.mxu2 %vm707_vm11, %v3458_v16  ;;  %2752 = vmatmul.msk.f32.vlgmr.msrb.gmra.mxu3 %vm707_vm11, %v3484_v19 }
 0x1c6   : > { %v761_v24 = vpop.permute.xlu0 %760 }
 0x1c7   : > { %2749 = vmatpush.xpose.msk.msrb.mxu2 %vm707_vm11, %v761_v24 }
 0x1ca   : > { %2750 = vmatmul.msk.f32.vlgmr.msrb.gmra.mxu2 %vm707_vm11, %v3478_v9 }
 0x1ce   : > { %v869_v49 = vpop.permute.xlu2 %868 }
 0x1d6   : > { %v815_v50 = vpop.permute.xlu1 %814  ;;  %v1162_v41 = vpop.permute.xlu2 %1161 }
 0x1d7   : > { %2753 = vmatpush.xpose.msk.msra.mxu2 %vm707_vm11, %v815_v50 }
 0x1da   : > { %2754 = vmatmul.msk.f32.vlgmr.msra.gmra.mxu2 %vm707_vm11, %v3490_v40 }
 0x1db   : > { %2757 = vmatpush.xpose.msk.msrb.mxu2 %vm707_vm11, %v869_v49 }
 0x1de   : > { %v842_v56 = vpop.permute.xlu0 %841  ;;  %v1190_v47 = vpop.permute.xlu2 %1189 }
 0x1df   : > { %2755 = vmatpush.xpose.msk.msra.mxu3 %vm707_vm11, %v842_v56 }
 0x1e2   : > { %2756 = vmatmul.msk.f32.vlgmr.msra.gmra.mxu3 %vm707_vm11, %v3496_v45  ;;  %2758 = vmatmul.msk.f32.vlgmr.msrb.gmra.mxu2 %vm707_vm11, %v3502_v46 }
 0x1e6   : > { %v1134_v7 = vpop.permute.xlu0 %1133  ;;  %v1216_v58 = vpop.permute.xlu2 %1215 }
 0x1e7   : > { %2761 = vmatpush.xpose.msk.msra.mxu2 %vm707_vm11, %v1134_v7 }
 0x1eb   : > { %2765 = vmatpush.xpose.msk.msrb.mxu2 %vm707_vm11, %v1190_v47 }
 0x1ee   : > { %v1160_v59 = vpop.permute.xlu0 %1159  ;;  %v1244_v8 = vpop.permute.xlu2 %1243 }
 0x1ef   : > { %v896_v62 = vpop.permute.xlu1 %895 }
 0x1f0   : > { %2759 = vmatpush.xpose.msk.msrb.mxu3 %vm707_vm11, %v896_v62 }
 0x1f3   : > { %2760 = vmatmul.msk.f32.vlgmr.msrb.gmra.mxu3 %vm707_vm11, %v3509_v48 }
 0x1f4   : > { %2763 = vmatpush.xpose.msk.msra.mxu3 %vm707_vm11, %v1162_v41 }
 0x1f6   : > { %v1188_v3 = vpop.permute.xlu0 %1187  ;;  %v1330_v13 = vpop.permute.xlu2 %1329 }
 0x1f7   : > { %v1132_v4 = vpop.permute.xlu1 %1131 }
 0x1f8   : > { %2762 = vmatmul.msk.f32.vlgmr.msra.gmra.mxu2 %vm707_vm11, %v1132_v4 }
 0x1fb   : > { %2764 = vmatmul.msk.f32.vlgmr.msra.gmra.mxu3 %vm707_vm11, %v1160_v59 }
 0x1fe   : > { %v1274_v10 = vpop.permute.xlu0 %1273  ;;  %v2878_v38 = vpop.permute.xlu2 %2877 }
 0x1ff   : > { %v1218_v55 = vpop.permute.xlu1 %1217  ;;  %v2880_v1 = vunpack.i.h.bf16 %v2878_v38  ;;  %v2879_v0 = vunpack.i.l.bf16 %v2878_v38 }
 0x200   : > { %2766 = vmatmul.msk.f32.vlgmr.msrb.gmra.mxu2 %vm707_vm11, %v1188_v3  ;;  %2767 = vmatpush.xpose.msk.msrb.mxu3 %vm707_vm11, %v1218_v55 }
 0x203   : > { %2768 = vmatmul.msk.f32.vlgmr.msrb.gmra.mxu3 %vm707_vm11, %v1216_v58 }
 0x204   : > { %2771 = vmatpush.xpose.msk.msra.mxu3 %vm707_vm11, %v1274_v10 }
 0x206   : > { %v1302_v15 = vpop.permute.xlu0 %1301 }
 0x207   : > { %v1246_v17 = vpop.permute.xlu1 %1245 }
 0x208   : > { %2775 = vmatpush.xpose.msk.msrb.mxu3 %vm707_vm11, %v1330_v13  ;;  %2769 = vmatpush.xpose.msk.msra.mxu2 %vm707_vm11, %v1246_v17 }
 0x20b   : > { %2770 = vmatmul.msk.f32.vlgmr.msra.gmra.mxu2 %vm707_vm11, %v1244_v8 }
 0x20c   : > { %2773 = vmatpush.xpose.msk.msrb.mxu2 %vm707_vm11, %v1302_v15 }
 0x20e   : > { %v1328_v27 = vpop.permute.xlu0 %1327 }
 0x20f   : > { %v1272_v20 = vpop.permute.xlu1 %1271 }
 0x210   : > { %2772 = vmatmul.msk.f32.vlgmr.msra.gmra.mxu3 %vm707_vm11, %v1272_v20 }
 0x216   : > { %v2873_v54 = vpop.permute.xlu0 %2872 }
 0x217   : > { %v1300_v11 = vpop.permute.xlu1 %1299  ;;  %v2875_v35 = vunpack.i.h.bf16 %v2873_v54  ;;  %v2874_v36 = vunpack.i.l.bf16 %v2873_v54 }
 0x218   : > { %2774 = vmatmul.msk.f32.vlgmr.msrb.gmra.mxu2 %vm707_vm11, %v1300_v11  ;;  %2776 = vmatmul.msk.f32.vlgmr.msrb.gmra.mxu3 %vm707_vm11, %v1328_v27 }
 0x219   : > { %1587 = vmatpush.msra.mxu2 %v2874_v36  ;;  %1614 = vmatpush.msra.mxu3 %v2875_v35 }
 0x21b   : > { %1695 = vmatpush.msrb.mxu2 %v2879_v0  ;;  %1722 = vmatpush.msrb.mxu3 %v2880_v1 }
 0x22d   : > { %v756_v44 = vpop.f32.mrf.mxu3 }
 0x22e   : > { %v3598_v21 = vmul.f32 0.5, %v756_v44 }
 0x230   : > { %v933_v61 = vsel %vm929_vm12, %v3598_v21, -inf }
 0x231   : > { %934 = vmax.xlane.f32.xlu1 %v933_v61 }
 0x23d   : > { %v729_v22 = vpop.f32.mrf.mxu2  ;;  %v810_v23 = vpop.f32.mrf.mxu3 }
 0x23e   : > { %v3602_v25 = vmul.f32 0.5, %v729_v22  ;;  %v3604_v28 = vmul.f32 0.5, %v810_v23 }
 0x240   : > { %v930_v53 = vsel %vm929_vm12, %v3602_v25, -inf  ;;  %v939_v29 = vsel %vm929_vm12, %v3604_v28, -inf }
 0x241   : > { %931 = vmax.xlane.f32.xlu2 %v930_v53  ;;  %940 = vmax.xlane.f32.xlu1 %v939_v29 }
 0x24d   : > { %v783_v30 = vpop.f32.mrf.mxu2 }
 0x24e   : > { %v3610_v31 = vmul.f32 0.5, %v783_v30 }
 0x250   : > { %v936_v32 = vsel %vm929_vm12, %v3610_v31, -inf }
 0x251   : > { %937 = vmax.xlane.f32.xlu2 %v936_v32  ;;  %v3664_v32 = vpack.i.bf16 %v3568_v39, %v3561_v57 }
 0x25d   : > { %v837_v33 = vpop.f32.mrf.mxu2 }
 0x25e   : > { %v3614_v34 = vmul.f32 0.5, %v837_v33 }
 0x260   : > { %v942_v60 = vsel %vm929_vm12, %v3614_v34, -inf }
 0x261   : > { %943 = vmax.xlane.f32.xlu1 %v942_v60 }
 0x265   : > { %v864_v37 = vpop.f32.mrf.mxu3  ;;  %v891_v12 = vpop.f32.mrf.mxu2 }
 0x266   : > { %v3618_v43 = vmul.f32 0.5, %v864_v37  ;;  %v3622_v14 = vmul.f32 0.5, %v891_v12 }
 0x268   : > { %v945_v2 = vsel %vm929_vm12, %v3618_v43, -inf  ;;  %v948_v18 = vsel %vm929_vm12, %v3622_v14, -inf }
 0x269   : > { %946 = vmax.xlane.f32.xlu0 %v945_v2 }
 0x271   : > { %949 = vmax.xlane.f32.xlu0 %v948_v18 }
 0x276   : > { %v918_v24 = vpop.f32.mrf.mxu3 }
 0x277   : > { %v3634_v58 = vmul.f32 0.5, %v918_v24 }
 0x279   : > { %v951_v3 = vsel %vm929_vm12, %v3634_v58, -inf }
 0x27b   : > { %v1156_v49 = vpop.f32.mrf.mxu2 }
 0x27c   : > { %v3626_v50 = vmul.f32 0.5, %v1156_v49 }
 0x27e   : > { %v1184_v41 = vpop.f32.mrf.mxu3  ;;  %v1363_v56 = vsel %vm929_vm12, %v3626_v50, -inf }
 0x27f   : > { %v3630_v47 = vmul.f32 0.5, %v1184_v41  ;;  %1364 = vmax.xlane.f32.xlu2 %v1363_v56 }
 0x281   : > { %v1366_v7 = vsel %vm929_vm12, %v3630_v47, -inf }
 0x282   : > { %1367 = vmax.xlane.f32.xlu1 %v1366_v7 }
 0x283   : > { %v1212_v59 = vpop.f32.mrf.mxu2 }
 0x284   : > { %v3636_v62 = vmul.f32 0.5, %v1212_v59 }
 0x286   : > { %v1369_v4 = vsel %vm929_vm12, %v3636_v62, -inf  ;;  %v1240_v8 = vpop.f32.mrf.mxu3 }
 0x287   : > { %952 = vmax.xlane.f32.xlu2 %v951_v3  ;;  %v3648_v20 = vmul.f32 0.5, %v1240_v8 }
 0x289   : > { %v1372_v11 = vsel %vm929_vm12, %v3648_v20, -inf }
 0x28a   : > { %1370 = vmax.xlane.f32.xlu1 %v1369_v4 }
 0x28e   : > { %v1268_v10 = vpop.f32.mrf.mxu2 }
 0x28f   : > { %v3642_v55 = vmul.f32 0.5, %v1268_v10 }
 0x291   : > { %v1375_v13 = vsel %vm929_vm12, %v3642_v55, -inf }
 0x292   : > { %1376 = vmax.xlane.f32.xlu0 %v1375_v13 }
 0x293   : > { %v1296_v15 = vpop.f32.mrf.mxu3 }
 0x294   : > { %v3646_v17 = vmul.f32 0.5, %v1296_v15 }
 0x296   : > { %v1378_v27 = vsel %vm929_vm12, %v3646_v17, -inf }
 0x297   : > { %1379 = vmax.xlane.f32.xlu2 %v1378_v27 }
 0x29a   : > { %1373 = vmax.xlane.f32.xlu0 %v1372_v11 }
 0x29b   : > { %v1324_v44 = vpop.f32.mrf.mxu2  ;;  %v1352_v61 = vpop.f32.mrf.mxu3 }
 0x29c   : > { %v3654_v22 = vmul.f32 0.5, %v1352_v61  ;;  %v3656_v23 = vmul.f32 0.5, %v1324_v44 }
 0x29e   : > { %v1384_v53 = vsel %vm929_vm12, %v3654_v22, -inf  ;;  %v1381_v29 = vsel %vm929_vm12, %v3656_v23, -inf }
 0x29f   : > { %1385 = vmax.xlane.f32.xlu2 %v1384_v53 }
 0x2a2   : > { %1382 = vmax.xlane.f32.xlu0 %v1381_v29 }
 0x2a4   : > { %v935_v30 = vpop.xlane.xlu1 %934 }
 0x2b4   : > { %v932_v33 = vpop.xlane.xlu2 %931  ;;  %v941_v54 = vpop.xlane.xlu1 %940 }
 0x2b5   : > { %v954_v60 = vsub.f32 %v3602_v25, %v932_v33  ;;  %v957_v36 = vsub.f32 %v3604_v28, %v941_v54  ;;  %v955_v28 = vsub.f32 %v3598_v21, %v935_v30 }
 0x2b6   : > { %2882 = vrot.lane.b32.xlu0 %v3664_v32, %s3109_s16 }
 0x2b7   : > { %v962_v35 = vmul.f32 1.442695, %v954_v60  ;;  %v968_v37 = vmul.f32 1.442695, %v957_v36  ;;  %v964_v41 = vmul.f32 1.442695, %v955_v28 }
 0x2b9   : > { %2933 = vpow2.f32 %v962_v35 }
 0x2ba   : > { %2935 = vpow2.f32 %v968_v37 }
 0x2bf   : > { %v3670_v38 = vpop.eup %2933 }
 0x2c0   : > { %v978_v2 = vsel %vm929_vm12, %v3670_v38, 0.0  ;;  %v3674_v0 = vpop.eup %2935 }
 0x2c1   : > { %979 = vadd.xlane.f32.xlu1 %v978_v2  ;;  %v987_v18 = vsel %vm929_vm12, %v3674_v0, 0.0 }
 0x2c4   : > { %v938_v1 = vpop.xlane.xlu2 %937 }
 0x2c5   : > { %v956_v25 = vsub.f32 %v3610_v31, %v938_v1 }
 0x2c7   : > { %v966_v12 = vmul.f32 1.442695, %v956_v25 }
 0x2c9   : > { %2937 = vpow2.f32 %v966_v12  ;;  %988 = vadd.xlane.f32.xlu1 %v987_v18 }
 0x2ca   : > { %2939 = vpow2.f32 %v964_v41 }
 0x2cf   : > { %v3680_v24 = vpop.eup %2937 }
 0x2d0   : > { %v984_v49 = vsel %vm929_vm12, %v3680_v24, 0.0  ;;  %v3685_v59 = vpop.eup %2939 }
 0x2d1   : > { %985 = vadd.xlane.f32.xlu2 %v984_v49  ;;  %v981_v10 = vsel %vm929_vm12, %v3685_v59, 0.0 }
 0x2d4   : > { %v944_v56 = vpop.xlane.xlu1 %943 }
 0x2d5   : > { %v958_v7 = vsub.f32 %v3614_v34, %v944_v56 }
 0x2d7   : > { %v970_v31 = vmul.f32 1.442695, %v958_v7 }
 0x2d9   : > { %2941 = vpow2.f32 %v970_v31 }
 0x2dc   : > { %v947_v3 = vpop.xlane.xlu0 %946 }
 0x2dd   : > { %v959_v4 = vsub.f32 %v3618_v43, %v947_v3 }
 0x2df   : > { %v3688_v8 = vpop.eup %2941  ;;  %v972_v21 = vmul.f32 1.442695, %v959_v4 }
 0x2e0   : > { %982 = vadd.xlane.f32.xlu0 %v981_v10  ;;  %v990_v13 = vsel %vm929_vm12, %v3688_v8, 0.0 }
 0x2e1   : > { %2943 = vpow2.f32 %v972_v21  ;;  %991 = vadd.xlane.f32.xlu2 %v990_v13 }
 0x2e4   : > { %v950_v34 = vpop.xlane.xlu0 %949 }
 0x2e5   : > { %v960_v15 = vsub.f32 %v3622_v14, %v950_v34 }
 0x2e7   : > { %v3695_v27 = vpop.eup %2943  ;;  %v974_v11 = vmul.f32 1.442695, %v960_v15 }
 0x2e8   : > { %v993_v43 = vsel %vm929_vm12, %v3695_v27, 0.0 }
 0x2e9   : > { %2945 = vpow2.f32 %v974_v11  ;;  %994 = vadd.xlane.f32.xlu1 %v993_v43 }
 0x2ef   : > { %v3699_v44 = vpop.eup %2945 }
 0x2f0   : > { %v996_v61 = vsel %vm929_vm12, %v3699_v44, 0.0 }
 0x2f1   : > { %997 = vadd.xlane.f32.xlu1 %v996_v61 }
 0x2f2   : > { %v1365_v53 = vpop.xlane.xlu2 %1364 }
 0x2f3   : > { %v1387_v29 = vsub.f32 %v3626_v50, %v1365_v53 }
 0x2f5   : > { %v1395_v30 = vmul.f32 1.442695, %v1387_v29  ;;  %v1368_v33 = vpop.xlane.xlu1 %1367 }
 0x2f6   : > { %v1388_v14 = vsub.f32 %v3630_v47, %v1368_v33 }
 0x2f7   : > { %2947 = vpow2.f32 %v1395_v30 }
 0x2f8   : > { %v1397_v54 = vmul.f32 1.442695, %v1388_v14 }
 0x2f9   : > { %1967 = vrot.lane.b32.xlu2 %v3458_v16, %s3110_s20 }
 0x2fa   : > { %2949 = vpow2.f32 %v1397_v54  ;;  %v953_v35 = vpop.xlane.xlu2 %952 }
 0x2fb   : > { %v961_v47 = vsub.f32 %v3634_v58, %v953_v35 }
 0x2fd   : > { %v3707_v60 = vpop.eup %2947  ;;  %v1371_v36 = vpop.xlane.xlu1 %1370  ;;  %v976_v12 = vmul.f32 1.442695, %v961_v47 }
 0x2fe   : > { %v1389_v37 = vsub.f32 %v3636_v62, %v1371_v36  ;;  %v1411_v50 = vsel %vm929_vm12, %v3707_v60, 0.0  ;;  %v3721_v62 = vpop.f32.mrf.mxu1 }
 0x2ff   : > { %1412 = vadd.xlane.f32.xlu1 %v1411_v50 }
 0x300   : > { %v3712_v2 = vpop.eup %2949  ;;  %v1399_v1 = vmul.f32 1.442695, %v1389_v37 }
 0x301   : > { %v1414_v25 = vsel %vm929_vm12, %v3712_v2, 0.0  ;;  %1995 = vrot.lane.b32.xlu2 %v3462_v42, %s3110_s20 }
 0x302   : > { %2951 = vpow2.f32 %v1399_v1  ;;  %1415 = vadd.xlane.f32.xlu0 %v1414_v25 }
 0x303   : > { %2953 = vpow2.f32 %v976_v12 }
 0x305   : > { %v1377_v58 = vpop.xlane.xlu0 %1376 }
 0x306   : > { %v3733_v56 = vpop.f32.mrf.mxu1  ;;  %v1391_v3 = vsub.f32 %v3642_v55, %v1377_v58 }
 0x307   : > { %v3737_v7 = vpack.i.bf16 %v3733_v56, %v3721_v62 }
 0x308   : > { %v3719_v18 = vpop.eup %2951  ;;  %v1403_v13 = vmul.f32 1.442695, %v1391_v3 }
 0x309   : > { %v1417_v28 = vsel %vm929_vm12, %v3719_v18, 0.0  ;;  %1993 = vrot.lane.b32.xlu2 %v3462_v42, %s3111_s21  ;;  %v3727_v49 = vpop.eup %2953 }
 0x30a   : > { %1418 = vadd.xlane.f32.xlu0 %v1417_v28  ;;  %v999_v41 = vsel %vm929_vm12, %v3727_v49, 0.0  ;;  %2955 = vpow2.f32 %v1403_v13 }
 0x30d   : > { %v1374_v31 = vpop.xlane.xlu0 %1373 }
 0x310   : > { %v3753_v55 = vpop.eup %2955 }
 0x311   : > { %2107 = vrot.lane.b32.xlu2 %v3496_v45, %s3110_s20  ;;  %v1423_v15 = vsel %vm929_vm12, %v3753_v55, 0.0 }
 0x312   : > { %1000 = vadd.xlane.f32.xlu0 %v999_v41 }
 0x315   : > { %v1383_v42 = vpop.xlane.xlu0 %1382 }
 0x318   : > { %2887 = vrot.lane.b32.xlu1 %v3737_v7, %s3109_s16 }
 0x320   : > { %1965 = vrot.lane.b32.xlu1 %v3458_v16, %s3111_s21  ;;  %v1390_v16 = vsub.f32 %v3648_v20, %v1374_v31  ;;  %v1380_v20 = vpop.xlane.xlu2 %1379 }
 0x321   : > { %v1392_v53 = vsub.f32 %v3646_v17, %v1380_v20 }
 0x322   : > { %v1401_v34 = vmul.f32 1.442695, %v1390_v16 }
 0x323   : > { %v1405_v29 = vmul.f32 1.442695, %v1392_v53 }
 0x324   : > { %2957 = vpow2.f32 %v1401_v34 }
 0x326   : > { %2077 = vrot.lane.b32.xlu0 %v3490_v40, %s3111_s21 }
 0x328   : > { %2079 = vrot.lane.b32.xlu1 %v3490_v40, %s3110_s20  ;;  %v2883_v4 = vpop.permute.xlu0 %2882  ;;  %v1393_v40 = vsub.f32 %v3656_v23, %v1383_v42  ;;  %v1386_v30 = vpop.xlane.xlu2 %1385 }
 0x329   : > { %v2884_v21 = vunpack.i.l.bf16 %v2883_v4  ;;  %v2885_v10 = vunpack.i.h.bf16 %v2883_v4  ;;  %v1394_v14 = vsub.f32 %v3654_v22, %v1386_v30 }
 0x32a   : > { %v1407_v11 = vmul.f32 1.442695, %v1393_v40  ;;  %v3760_v43 = vpop.eup %2957 }
 0x32b   : > { %1641 = vmatpush.msrb.mxu0 %v2884_v21  ;;  %1668 = vmatpush.msrb.mxu1 %v2885_v10  ;;  %v1409_v54 = vmul.f32 1.442695, %v1394_v14  ;;  %v3806_v14 = vld [vmem:[%s4357_s5 + $0x8] sm:$0xff] }
 0x32c   : > { %2959 = vpow2.f32 %v1407_v11 }
 0x32d   : > { %2961 = vpow2.f32 %v1405_v29 }
 0x32e   : > { %2135 = vrot.lane.b32.xlu0 %v3502_v46, %s3110_s20  ;;  %2963 = vpow2.f32 %v1409_v54 }
 0x330   : > { %2105 = vrot.lane.b32.xlu1 %v3496_v45, %s3111_s21  ;;  %v1420_v45 = vsel %vm929_vm12, %v3760_v43, 0.0 }
 0x332   : > { %v3764_v61 = vpop.eup %2959 }
 0x333   : > { %v1429_v23 = vsel %vm929_vm12, %v3764_v61, 0.0  ;;  %v3772_v35 = vpop.eup %2961 }
 0x334   : > { %v3769_v33 = vpop.xlane.xlu1 %979  ;;  %v1426_v17 = vsel %vm929_vm12, %v3772_v35, 0.0  ;;  %v3778_v37 = vpop.eup %2963 }
 0x335   : > { %v1432_v47 = vsel %vm929_vm12, %v3778_v37, 0.0 }
 0x336   : > { %2161 = vrot.lane.b32.xlu0 %v3509_v48, %s3111_s21 }
 0x33a   : > { %1424 = vadd.xlane.f32.xlu2 %v1423_v15 }
 0x33c   : > { %v3774_v36 = vpop.xlane.xlu1 %988 }
 0x342   : > { %1421 = vadd.xlane.f32.xlu2 %v1420_v45 }
 0x344   : > { %v3794_v12 = vpop.xlane.xlu2 %985 }
 0x34a   : > { %1430 = vadd.xlane.f32.xlu2 %v1429_v23 }
 0x353   : > { %v3790_v1 = vpop.xlane.xlu0 %982 }
 0x354   : > { %v3798_v3 = vpop.xlane.xlu2 %991 }
 0x35a   : > { %1427 = vadd.xlane.f32.xlu1 %v1426_v17 }
 0x35c   : > { %v3780_v50 = vpop.xlane.xlu1 %994 }
 0x362   : > { %1433 = vadd.xlane.f32.xlu1 %v1432_v47  ;;  %2023 = vrot.lane.b32.xlu2 %v3478_v9, %s3110_s20 }
 0x364   : > { %v3786_v22 = vpop.xlane.xlu1 %997 }
 0x36a   : > { %2021 = vrot.lane.b32.xlu2 %v3478_v9, %s3111_s21 }
 0x372   : > { %v1413_v25 = vpop.xlane.xlu1 %1412  ;;  %2163 = vrot.lane.b32.xlu2 %v3509_v48, %s3110_s20 }
 0x373   : > { %2965 = vrcp.f32 %v1413_v25  ;;  %v1446_v9 = vand.u32 2147483648, %v1413_v25  ;;  %v1444_v48 = vand.u32 2147483647, %v1413_v25  ;;  %vm1440_vm14 = vweird.f32 %v1413_v25 }
 0x375   : > { %v1416_v28 = vpop.xlane.xlu0 %1415  ;;  %v1447_v40 = vor.u32 1.1754944e-38, %v1446_v9  ;;  %vm1445_vm2 = vcmp.eq.f32.partialorder %v1444_v48, 8.507059e+37 }
 0x376   : > { %2967 = vrcp.f32 %v1416_v28  ;;  %v1461_v34 = vand.u32 2147483648, %v1416_v28  ;;  %v1459_v11 = vand.u32 2147483647, %v1416_v28  ;;  %vm1455_vm3 = vweird.f32 %v1416_v28 }
 0x378   : > { %v1462_v30 = vor.u32 1.1754944e-38, %v1461_v34  ;;  %vm1460_vm5 = vcmp.eq.f32.partialorder %v1459_v11, 8.507059e+37 }
 0x379   : > { %v2966_v58 = vpop.eup %2965 }
 0x37a   : > { %v1436_v41 = vmul.f32 %v2966_v58, %v1413_v25  ;;  %vm1441_vm13 = vweird.f32 %v2966_v58  ;;  %v3808_v25 = vpop.permute.xlu2 %1967 }
 0x37b   : > { %2051 = vrot.lane.b32.xlu1 %v3484_v19, %s3110_s20  ;;  %vm1442_vm15 = vmor %vm1440_vm14, %vm1441_vm13  ;;  %vm1007_vm14 = vweird.f32 %v3769_v33 }
 0x37c   : > { %v2968_v31 = vpop.eup %2967  ;;  %v1437_v42 = vsub.f32 1.0, %v1436_v41 }
 0x37d   : > { %v1451_v4 = vmul.f32 %v2968_v31, %v1416_v28  ;;  %v1419_v21 = vpop.xlane.xlu0 %1418  ;;  %vm1456_vm1 = vweird.f32 %v2968_v31 }
 0x37e   : > { %v1438_v10 = vmul.f32 %v2966_v58, %v1437_v42  ;;  %2969 = vrcp.f32 %v1419_v21  ;;  %vm1457_vm4 = vmor %vm1455_vm3, %vm1456_vm1  ;;  %v1476_v41 = vand.u32 2147483648, %v1419_v21  ;;  %v1474_v42 = vand.u32 2147483647, %v1419_v21 }
 0x37f   : > { %v1452_v13 = vsub.f32 1.0, %v1451_v4  ;;  %vm1470_vm7 = vweird.f32 %v1419_v21  ;;  %2971 = vrcp.f32 %v3769_v33 }
 0x380   : > { %v1439_v16 = vadd.f32 %v2966_v58, %v1438_v10  ;;  %vm1475_vm9 = vcmp.eq.f32.partialorder %v1474_v42, 8.507059e+37  ;;  %2973 = vrcp.f32 %v3798_v3 }
 0x381   : > { %v1453_v15 = vmul.f32 %v2968_v31, %v1452_v13 }
 0x382   : > { %v1443_v45 = vsel %vm1442_vm15, %v2966_v58, %v1439_v16  ;;  %v3820_v34 = vpop.permute.xlu2 %1995 }
 0x383   : > { %v1448_v20 = vsel %vm1445_vm2, %v1447_v40, %v1443_v45  ;;  %v1454_v53 = vadd.f32 %v2968_v31, %v1453_v15  ;;  %2049 = vrot.lane.b32.xlu1 %v3484_v19, %s3111_s21 }
 0x384   : > { %v2970_v23 = vpop.eup %2969  ;;  %v1449_v29 = vmul.f32 %v3707_v60, %v1448_v20 }
 0x385   : > { %v1458_v54 = vsel %vm1457_vm4, %v2968_v31, %v1454_v53  ;;  %v1466_v17 = vmul.f32 %v2970_v23, %v1419_v21  ;;  %vm1471_vm6 = vweird.f32 %v2970_v23  ;;  %v2972_v40 = vpop.eup %2971 }
 0x386   : > { %v1463_v47 = vsel %vm1460_vm5, %v1462_v30, %v1458_v54  ;;  %v1557_v19 = vmul.f32 %v3806_v14, %v1449_v29  ;;  %vm1472_vm8 = vmor %vm1470_vm7, %vm1471_vm6  ;;  %v1003_v15 = vmul.f32 %v2972_v40, %v3769_v33  ;;  %v3835_v20 = vpop.eup %2973  ;;  %vm1008_vm10 = vweird.f32 %v2972_v40 }
 0x387   : > { %v1464_v28 = vmul.f32 %v3712_v2, %v1463_v47  ;;  %v1467_v58 = vsub.f32 1.0, %v1466_v17  ;;  %v1477_v2 = vor.u32 1.1754944e-38, %v1476_v41  ;;  %v1063_v54 = vmul.f32 %v3835_v20, %v3798_v3  ;;  %vm3849_vm15 = vmor %vm1007_vm14, %vm1008_vm10 }
 0x388   : > { %2778 = vmatmul.msk.f32.vlgmr.msra.gmra.mxu2 %vm929_vm12, %v1557_v19  ;;  %v1004_v11 = vsub.f32 1.0, %v1003_v15  ;;  %vm1068_vm6 = vweird.f32 %v3835_v20 }
 0x389   : > { %v1468_v60 = vmul.f32 %v2970_v23, %v1467_v58  ;;  %v1558_v9 = vmul.f32 %v3806_v14, %v1464_v28  ;;  %1799 = vmatpush.msra.mxu2 %v3546_v26  ;;  %v1013_v28 = vand.u32 2147483648, %v3769_v33 }
 0x38a   : > { %v2888_v31 = vpop.permute.xlu1 %2887  ;;  %v1005_v53 = vmul.f32 %v2972_v40, %v1004_v11 }
 0x38b   : > { %v1469_v4 = vadd.f32 %v2970_v23, %v1468_v60  ;;  %v2890_v10 = vunpack.i.h.bf16 %v2888_v31  ;;  %v2889_v48 = vunpack.i.l.bf16 %v2888_v31  ;;  %2133 = vrot.lane.b32.xlu1 %v3502_v46, %s3111_s21  ;;  %2779 = vmatmul.msk.f32.vlgmr.msra.gmra.mxu3 %vm929_vm12, %v1558_v9  ;;  %v3825_v46 = vpop.permute.xlu2 %1993  ;;  %v1011_v60 = vand.u32 2147483647, %v3769_v33 }
 0x38c   : > { %1822 = vmatpush.msra.mxu3 %v3549_v51  ;;  %v1006_v47 = vadd.f32 %v2972_v40, %v1005_v53  ;;  %v1064_v31 = vsub.f32 1.0, %v1063_v54  ;;  %v1073_v9 = vand.u32 2147483648, %v3798_v3 }
 0x38d   : > { %v1473_v13 = vsel %vm1472_vm8, %v2970_v23, %v1469_v4  ;;  %1749 = vmatpush.msra.mxu0 %v2889_v48  ;;  %1776 = vmatpush.msra.mxu1 %v2890_v10  ;;  %vm1012_vm4 = vcmp.eq.f32.partialorder %v1011_v60, 8.507059e+37  ;;  %v3878_v60 = vld [vmem:[%s4357_s5] sm:$0xff] }
 0x38e   : > { %v1478_v16 = vsel %vm1475_vm9, %v1477_v2, %v1473_v13  ;;  %v1010_v2 = vsel %vm3849_vm15, %v2972_v40, %v1006_v47  ;;  %v1014_v13 = vor.u32 1.1754944e-38, %v1013_v28  ;;  %v1065_v53 = vmul.f32 %v3835_v20, %v1064_v31 }
 0x38f   : > { %v1479_v26 = vmul.f32 %v3719_v18, %v1478_v16  ;;  %vm1067_vm9 = vweird.f32 %v3798_v3 }
 0x391   : > { %v1559_v21 = vmul.f32 %v3806_v14, %v1479_v26 }
 0x392   : > { %v3833_v45 = vpop.permute.xlu1 %1965 }
 0x393   : > { %2780 = vmatmul.msk.f32.vlgmr.msrb.gmra.mxu0 %vm929_vm12, %v1559_v21  ;;  %v3828_v51 = vpop.permute.xlu2 %2107 }
 0x394   : > { %1845 = vmatpush.msrb.mxu0 %v3561_v57 }
 0x39a   : > { %v3853_v4 = vpop.permute.xlu1 %2079 }
 0x3ad   : > { %v1425_v18 = vpop.xlane.xlu2 %1424 }
 0x3ae   : > { %2975 = vrcp.f32 %v1425_v18  ;;  %v1506_v58 = vand.u32 2147483648, %v1425_v18  ;;  %v1504_v41 = vand.u32 2147483647, %v1425_v18  ;;  %vm1500_vm1 = vweird.f32 %v1425_v18 }
 0x3af   : > { %2977 = vrcp.f32 %v3794_v12 }
 0x3b0   : > { %v1507_v16 = vor.u32 1.1754944e-38, %v1506_v58  ;;  %vm1505_vm3 = vcmp.eq.f32.partialorder %v1504_v41, 8.507059e+37  ;;  %v1066_v41 = vadd.f32 %v3835_v20, %v1065_v53 }
 0x3b4   : > { %v2976_v57 = vpop.eup %2975 }
 0x3b5   : > { %v1496_v23 = vmul.f32 %v2976_v57, %v1425_v18  ;;  %v3837_v29 = vpop.xlane.xlu2 %1421  ;;  %v3840_v30 = vpop.eup %2977  ;;  %vm1501_vm13 = vweird.f32 %v2976_v57  ;;  %v1015_v18 = vsel %vm1012_vm4, %v1014_v13, %v1010_v2 }
 0x3b6   : > { %2979 = vrcp.f32 %v3837_v29  ;;  %v1033_v42 = vmul.f32 %v3840_v30, %v3794_v12  ;;  %vm1502_vm2 = vmor %vm1500_vm1, %vm1501_vm13  ;;  %v1491_v54 = vand.u32 2147483648, %v3837_v29  ;;  %v1016_v28 = vmul.f32 %v3670_v38, %v1015_v18 }
 0x3b7   : > { %v1497_v17 = vsub.f32 1.0, %v1496_v23  ;;  %2981 = vrcp.f32 %v3786_v22  ;;  %vm1485_vm7 = vweird.f32 %v3837_v29  ;;  %v1071_v38 = vand.u32 2147483647, %v3798_v3  ;;  %vm3891_vm13 = vmor %vm1067_vm9, %vm1068_vm6 }
 0x3b8   : > { %v1034_v15 = vsub.f32 1.0, %v1033_v42  ;;  %v1492_v31 = vor.u32 1.1754944e-38, %v1491_v54  ;;  %vm1038_vm14 = vweird.f32 %v3840_v30  ;;  %v1070_v3 = vsel %vm3891_vm13, %v3835_v20, %v1066_v41 }
 0x3b9   : > { %v1498_v19 = vmul.f32 %v2976_v57, %v1497_v17  ;;  %vm1072_vm15 = vcmp.eq.f32.partialorder %v1071_v38, 8.507059e+37  ;;  %vm1097_vm9 = vweird.f32 %v3786_v22 }
 0x3ba   : > { %v1035_v58 = vmul.f32 %v3840_v30, %v1034_v15 }
 0x3bb   : > { %v1499_v10 = vadd.f32 %v2976_v57, %v1498_v19 }
 0x3bc   : > { %v2980_v48 = vpop.eup %2979  ;;  %v1036_v15 = vadd.f32 %v3840_v30, %v1035_v58  ;;  %v1041_v58 = vand.u32 2147483647, %v3794_v12 }
 0x3bd   : > { %v1503_v33 = vsel %vm1502_vm2, %v2976_v57, %v1499_v10  ;;  %v1481_v26 = vmul.f32 %v2980_v48, %v3837_v29  ;;  %v3859_v21 = vpop.xlane.xlu2 %1430  ;;  %vm1486_vm5 = vweird.f32 %v2980_v48  ;;  %v1489_v57 = vand.u32 2147483647, %v3837_v29  ;;  %v3869_v19 = vpop.eup %2981 }
 0x3be   : > { %v1508_v11 = vsel %vm1505_vm3, %v1507_v16, %v1503_v33  ;;  %2983 = vrcp.f32 %v3859_v21  ;;  %vm1487_vm8 = vmor %vm1485_vm7, %vm1486_vm5  ;;  %v3886_v29 = vpop.permute.xlu1 %2105  ;;  %v1093_v16 = vmul.f32 %v3869_v19, %v3786_v22  ;;  %v1536_v18 = vand.u32 2147483648, %v3859_v21 }
 0x3bf   : > { %v1509_v40 = vmul.f32 %v3753_v55, %v1508_v11  ;;  %v1482_v23 = vsub.f32 1.0, %v1481_v26  ;;  %2985 = vrcp.f32 %v3790_v1  ;;  %vm1490_vm10 = vcmp.eq.f32.partialorder %v1489_v57, 8.507059e+37 }
 0x3c0   : > { %v1074_v11 = vor.u32 1.1754944e-38, %v1073_v9  ;;  %vm1037_vm2 = vweird.f32 %v3794_v12  ;;  %v1043_v57 = vand.u32 2147483648, %v3794_v12  ;;  %vm1530_vm4 = vweird.f32 %v3859_v21 }
 0x3c1   : > { %v1483_v17 = vmul.f32 %v2980_v48, %v1482_v23  ;;  %v1561_v47 = vmul.f32 %v3806_v14, %v1509_v40  ;;  %v1534_v40 = vand.u32 2147483647, %v3859_v21  ;;  %vm3912_vm3 = vmor %vm1037_vm2, %vm1038_vm14  ;;  %2987 = vrcp.f32 %v3774_v36 }
 0x3c2   : > { %v1075_v20 = vsel %vm1072_vm15, %v1074_v11, %v1070_v3  ;;  %v1537_v41 = vor.u32 1.1754944e-38, %v1536_v18  ;;  %2989 = vrcp.f32 %v3780_v50  ;;  %vm1042_vm7 = vcmp.eq.f32.partialorder %v1041_v58, 8.507059e+37 }
 0x3c3   : > { %v1484_v55 = vadd.f32 %v2980_v48, %v1483_v17  ;;  %2782 = vmatmul.msk.f32.vlgmr.msrb.gmra.mxu2 %vm929_vm12, %v1561_v47  ;;  %v1094_v17 = vsub.f32 1.0, %v1093_v16  ;;  %vm1535_vm6 = vcmp.eq.f32.partialorder %v1534_v40, 8.507059e+37  ;;  %v3944_v16 = vpop.xlane.xlu0 %1000 }
 0x3c4   : > { %v2984_v42 = vpop.eup %2983  ;;  %1891 = vmatpush.msrb.mxu2 %v3571_v63  ;;  %v1123_v63 = vmul.f32 %v3878_v60, %v1016_v28  ;;  %v1040_v28 = vsel %vm3912_vm3, %v3840_v30, %v1036_v15 }
 0x3c5   : > { %v1488_v10 = vsel %vm1487_vm8, %v2980_v48, %v1484_v55  ;;  %v1526_v2 = vmul.f32 %v2984_v42, %v3859_v21  ;;  %vm1531_vm1 = vweird.f32 %v2984_v42  ;;  %v3907_v54 = vpop.eup %2985  ;;  %v1076_v21 = vmul.f32 %v3688_v8, %v1075_v20  ;;  %v2024_v58 = vpop.permute.xlu2 %2023 }
 0x3c6   : > { %v1493_v33 = vsel %vm1490_vm10, %v1492_v31, %v1488_v10  ;;  %vm1532_vm5 = vmor %vm1530_vm4, %vm1531_vm1  ;;  %v1018_v30 = vmul.f32 %v3907_v54, %v3790_v1  ;;  %v1095_v12 = vmul.f32 %v3869_v19, %v1094_v17  ;;  %vm1098_vm8 = vweird.f32 %v3869_v19 }
 0x3c7   : > { %v1527_v48 = vsub.f32 1.0, %v1526_v2  ;;  %v1494_v26 = vmul.f32 %v3760_v43, %v1493_v33  ;;  %v3940_v10 = vpop.eup %2987  ;;  %vm1099_vm10 = vmor %vm1097_vm9, %vm1098_vm8  ;;  %vm1023_vm15 = vweird.f32 %v3907_v54  ;;  %vm1022_vm1 = vweird.f32 %v3790_v1 }
 0x3c8   : > { %v1019_v2 = vsub.f32 1.0, %v1018_v30  ;;  %v1096_v13 = vadd.f32 %v3869_v19, %v1095_v12  ;;  %v3946_v33 = vpop.eup %2989  ;;  %v1048_v11 = vmul.f32 %v3940_v10, %v3774_v36  ;;  %v1028_v30 = vand.u32 2147483648, %v3790_v1 }
 0x3c9   : > { %v1528_v53 = vmul.f32 %v2984_v42, %v1527_v48  ;;  %v1560_v23 = vmul.f32 %v3806_v14, %v1494_v26  ;;  %v1101_v48 = vand.u32 2147483647, %v3786_v22  ;;  %vm1052_vm4 = vweird.f32 %v3774_v36 }
 0x3ca   : > { %v1100_v18 = vsel %vm1099_vm10, %v3869_v19, %v1096_v13  ;;  %v1049_v43 = vsub.f32 1.0, %v1048_v11  ;;  %vm1053_vm9 = vweird.f32 %v3940_v10  ;;  %vm1083_vm10 = vweird.f32 %v3946_v33 }
 0x3cb   : > { %v1529_v47 = vadd.f32 %v2984_v42, %v1528_v53  ;;  %2781 = vmatmul.msk.f32.vlgmr.msrb.gmra.mxu1 %vm929_vm12, %v1560_v23  ;;  %2786 = vmatmul.msk.f32.vlgmr.msra.gmra.mxu2 %vm929_vm12, %v1123_v63  ;;  %v1103_v63 = vand.u32 2147483648, %v3786_v22  ;;  %vm1102_vm13 = vcmp.eq.f32.partialorder %v1101_v48, 8.507059e+37 }
 0x3cc   : > { %1868 = vmatpush.msrb.mxu1 %v3568_v39  ;;  %2794 = vmatpush.xpose.msk.msra.mxu2 %vm707_vm11, %v3808_v25  ;;  %v1044_v39 = vor.u32 1.1754944e-38, %v1043_v57  ;;  %v2078_v57 = vpop.permute.xlu0 %2077 }
 0x3cd   : > { %v1533_v55 = vsel %vm1532_vm5, %v2984_v42, %v1529_v47  ;;  %v3931_v38 = vpop.xlane.xlu1 %1427  ;;  %v1127_v42 = vmul.f32 %v3878_v60, %v1076_v21  ;;  %v1104_v22 = vor.u32 1.1754944e-38, %v1103_v63  ;;  %vm3990_vm5 = vmor %vm1022_vm1, %vm1023_vm15  ;;  %v1029_v63 = vor.u32 1.1754944e-38, %v1028_v30 }
 0x3ce   : > { %v1538_v9 = vsel %vm1535_vm6, %v1537_v41, %v1533_v55  ;;  %2991 = vrcp.f32 %v3931_v38  ;;  %v1045_v25 = vsel %vm1042_vm7, %v1044_v39, %v1040_v28  ;;  %v1521_v53 = vand.u32 2147483648, %v3931_v38  ;;  %vm4025_vm1 = vmor %vm1052_vm4, %vm1053_vm9 }
 0x3cf   : > { %v1539_v31 = vmul.f32 %v3764_v61, %v1538_v9  ;;  %v1046_v3 = vmul.f32 %v3680_v24, %v1045_v25  ;;  %2993 = vrcp.f32 %v3944_v16  ;;  %v1020_v24 = vmul.f32 %v3907_v54, %v1019_v2 }
 0x3d0   : > { %v1105_v23 = vsel %vm1102_vm13, %v1104_v22, %v1100_v18  ;;  %v1519_v17 = vand.u32 2147483647, %v3931_v38  ;;  %vm1515_vm2 = vweird.f32 %v3931_v38  ;;  %v1026_v55 = vand.u32 2147483647, %v3790_v1 }
 0x3d1   : > { %v1563_v8 = vmul.f32 %v3806_v14, %v1539_v31  ;;  %v1125_v40 = vmul.f32 %v3878_v60, %v1046_v3  ;;  %v1021_v19 = vadd.f32 %v3907_v54, %v1020_v24  ;;  %v1106_v12 = vmul.f32 %v3699_v44, %v1105_v23 }
 0x3d2   : > { %v1522_v9 = vor.u32 1.1754944e-38, %v1521_v53  ;;  %vm1520_vm6 = vcmp.eq.f32.partialorder %v1519_v17, 8.507059e+37  ;;  %v1050_v44 = vmul.f32 %v3940_v10, %v1049_v43  ;;  %v1056_v31 = vand.u32 2147483647, %v3774_v36 }
 0x3d3   : > { %2784 = vmatmul.msk.f32.vlgmr.msra.gmra.mxu0 %vm929_vm12, %v1563_v8  ;;  %2790 = vmatmul.msk.f32.vlgmr.msrb.gmra.mxu2 %vm929_vm12, %v1127_v42  ;;  %v1025_v25 = vsel %vm3990_vm5, %v3907_v54, %v1021_v19  ;;  %vm1027_vm7 = vcmp.eq.f32.partialorder %v1026_v55, 8.507059e+37  ;;  %v1129_v3 = vmul.f32 %v3878_v60, %v1106_v12  ;;  %v1058_v22 = vand.u32 2147483648, %v3774_v36 }
 0x3d4   : > { %v2992_v61 = vpop.eup %2991  ;;  %1937 = vmatpush.msra.mxu0 %v3721_v62  ;;  %2802 = vmatpush.xpose.msk.msrb.mxu2 %vm707_vm11, %v3853_v4  ;;  %v1078_v62 = vmul.f32 %v3946_v33, %v3780_v50  ;;  %v1051_v11 = vadd.f32 %v3940_v10, %v1050_v44  ;;  %v1030_v24 = vsel %vm1027_vm7, %v1029_v63, %v1025_v25  ;;  %v2136_v53 = vpop.permute.xlu0 %2135  ;;  %vm1057_vm4 = vcmp.eq.f32.partialorder %v1056_v31, 8.507059e+37 }
 0x3d5   : > { %v1511_v26 = vmul.f32 %v2992_v61, %v3931_v38  ;;  %v3959_v15 = vpop.xlane.xlu1 %1433  ;;  %vm1516_vm14 = vweird.f32 %v2992_v61  ;;  %v3973_v47 = vpop.eup %2993  ;;  %v1031_v23 = vmul.f32 %v3685_v59, %v1030_v24  ;;  %vm1112_vm7 = vweird.f32 %v3944_v16 }
 0x3d6   : > { %2995 = vrcp.f32 %v3959_v15  ;;  %v1079_v28 = vsub.f32 1.0, %v1078_v62  ;;  %vm1517_vm3 = vmor %vm1515_vm2, %vm1516_vm14  ;;  %v1108_v1 = vmul.f32 %v3973_v47, %v3944_v16  ;;  %vm1545_vm13 = vweird.f32 %v3959_v15 }
 0x3d7   : > { %v1512_v4 = vsub.f32 1.0, %v1511_v26  ;;  %v1549_v26 = vand.u32 2147483647, %v3959_v15  ;;  %vm1082_vm14 = vweird.f32 %v3780_v50  ;;  %v1055_v36 = vsel %vm4025_vm1, %v3940_v10, %v1051_v11  ;;  %v2022_v10 = vpop.permute.xlu2 %2021 }
 0x3d8   : > { %v1080_v42 = vmul.f32 %v3946_v33, %v1079_v28  ;;  %v1109_v18 = vsub.f32 1.0, %v1108_v1  ;;  %v1116_v30 = vand.u32 2147483647, %v3944_v16 }
 0x3d9   : > { %v1513_v20 = vmul.f32 %v2992_v61, %v1512_v4  ;;  %v1088_v4 = vand.u32 2147483648, %v3780_v50  ;;  %vm1550_vm2 = vcmp.eq.f32.partialorder %v1549_v26, 8.507059e+37 }
 0x3da   : > { %v1110_v19 = vmul.f32 %v3973_v47, %v1109_v18  ;;  %vm1117_vm9 = vcmp.eq.f32.partialorder %v1116_v30, 8.507059e+37 }
 0x3db   : > { %v1514_v41 = vadd.f32 %v2992_v61, %v1513_v20  ;;  %2788 = vmatmul.msk.f32.vlgmr.msrb.gmra.mxu0 %vm929_vm12, %v1125_v40  ;;  %2795 = vmatmul.msk.f32.vlgmr.msra.gmra.mxu2 %vm707_vm11, %v3833_v45  ;;  %v1086_v20 = vand.u32 2147483647, %v3780_v50  ;;  %v1089_v50 = vor.u32 1.1754944e-38, %v1088_v4 }
 0x3dc   : > { %v2996_v21 = vpop.eup %2995  ;;  %2798 = vmatpush.xpose.msk.msrb.mxu0 %vm707_vm11, %v2024_v58  ;;  %v1124_v58 = vmul.f32 %v3878_v60, %v1031_v23  ;;  %v1111_v55 = vadd.f32 %v3973_v47, %v1110_v19 }
 0x3dd   : > { %v1518_v38 = vsel %vm1517_vm3, %v2992_v61, %v1514_v41  ;;  %v1541_v39 = vmul.f32 %v2996_v21, %v3959_v15  ;;  %v1551_v61 = vand.u32 2147483648, %v3959_v15  ;;  %vm1546_vm8 = vweird.f32 %v2996_v21  ;;  %vm1084_vm3 = vmor %vm1082_vm14, %vm1083_vm10 }
 0x3de   : > { %v1523_v8 = vsel %vm1520_vm6, %v1522_v9, %v1518_v38  ;;  %vm1547_vm15 = vmor %vm1545_vm13, %vm1546_vm8  ;;  %vm1087_vm5 = vcmp.eq.f32.partialorder %v1086_v20, 8.507059e+37  ;;  %vm1113_vm6 = vweird.f32 %v3973_v47 }
 0x3df   : > { %v1524_v2 = vmul.f32 %v3772_v35, %v1523_v8  ;;  %v1542_v13 = vsub.f32 1.0, %v1541_v39  ;;  %v1081_v35 = vadd.f32 %v3946_v33, %v1080_v42  ;;  %v1552_v40 = vor.u32 1.1754944e-38, %v1551_v61  ;;  %vm1114_vm8 = vmor %vm1112_vm7, %vm1113_vm6 }
 0x3e0   : > { %v1115_v9 = vsel %vm1114_vm8, %v3973_v47, %v1111_v55  ;;  %v2164_v47 = vpop.permute.xlu2 %2163 }
 0x3e1   : > { %v1543_v48 = vmul.f32 %v2996_v21, %v1542_v13  ;;  %v1562_v54 = vmul.f32 %v3806_v14, %v1524_v2  ;;  %v1085_v43 = vsel %vm1084_vm3, %v3946_v33, %v1081_v35 }
 0x3e3   : > { %v1544_v62 = vadd.f32 %v2996_v21, %v1543_v48  ;;  %2783 = vmatmul.msk.f32.vlgmr.msrb.gmra.mxu3 %vm929_vm12, %v1562_v54  ;;  %2792 = vmatmul.msk.f32.vlgmr.msra.gmra.mxu0 %vm929_vm12, %v1129_v3 }
 0x3e4   : > { %1914 = vmatpush.msrb.mxu3 %v3577_v5  ;;  %2803 = vmatmul.msk.f32.vlgmr.msrb.gmra.mxu2 %vm707_vm11, %v2078_v57  ;;  %v1059_v57 = vor.u32 1.1754944e-38, %v1058_v22 }
 0x3e5   : > { %v1548_v17 = vsel %vm1547_vm15, %v2996_v21, %v1544_v62  ;;  %2806 = vmatpush.xpose.msk.msra.mxu0 %vm707_vm11, %v2136_v53  ;;  %v1090_v21 = vsel %vm1087_vm5, %v1089_v50, %v1085_v43 }
 0x3e6   : > { %v1553_v5 = vsel %vm1550_vm2, %v1552_v40, %v1548_v17  ;;  %v1060_v41 = vsel %vm1057_vm4, %v1059_v57, %v1055_v36  ;;  %v1091_v33 = vmul.f32 %v3695_v27, %v1090_v21 }
 0x3e7   : > { %v1554_v59 = vmul.f32 %v3778_v37, %v1553_v5  ;;  %v1118_v37 = vand.u32 2147483648, %v3944_v16 }
 0x3e9   : > { %v1564_v28 = vmul.f32 %v3806_v14, %v1554_v59  ;;  %v1061_v14 = vmul.f32 %v3674_v0, %v1060_v41  ;;  %v1119_v45 = vor.u32 1.1754944e-38, %v1118_v37 }
 0x3eb   : > { %2785 = vmatmul.msk.f32.vlgmr.msra.gmra.mxu1 %vm929_vm12, %v1564_v28  ;;  %2787 = vmatmul.msk.f32.vlgmr.msra.gmra.mxu3 %vm929_vm12, %v1124_v58  ;;  %v1120_v38 = vsel %vm1117_vm9, %v1119_v45, %v1115_v9 }
 0x3ec   : > { %1960 = vmatpush.msra.mxu1 %v3733_v56  ;;  %2796 = vmatpush.xpose.msk.msra.mxu3 %vm707_vm11, %v3820_v34  ;;  %v1126_v56 = vmul.f32 %v3878_v60, %v1061_v14  ;;  %v1128_v34 = vmul.f32 %v3878_v60, %v1091_v33  ;;  %v1121_v0 = vmul.f32 %v3727_v49, %v1120_v38  ;;  %v2162_v49 = vpop.permute.xlu0 %2161 }
 0x3ed   : > { %2799 = vmatmul.msk.f32.vlgmr.msrb.gmra.mxu0 %vm707_vm11, %v2022_v10  ;;  %v2052_v12 = vpop.permute.xlu1 %2051 }
 0x3ee   : > { %v1130_v16 = vmul.f32 %v3878_v60, %v1121_v0 }
 0x3f3   : > { %2789 = vmatmul.msk.f32.vlgmr.msrb.gmra.mxu1 %vm929_vm12, %v1126_v56  ;;  %2791 = vmatmul.msk.f32.vlgmr.msrb.gmra.mxu3 %vm929_vm12, %v1128_v34 }
 0x3f4   : > { %2800 = vmatpush.xpose.msk.msrb.mxu1 %vm707_vm11, %v2052_v12  ;;  %2804 = vmatpush.xpose.msk.msrb.mxu3 %vm707_vm11, %v3828_v51 }
 0x3f5   : > { %v2050_v27 = vpop.permute.xlu1 %2049 }
 0x3fb   : > { %2793 = vmatmul.msk.f32.vlgmr.msra.gmra.mxu1 %vm929_vm12, %v1130_v16  ;;  %2797 = vmatmul.msk.f32.vlgmr.msra.gmra.mxu3 %vm707_vm11, %v3825_v46 }
 0x3fc   : > { %2808 = vmatpush.xpose.msk.msra.mxu1 %vm707_vm11, %v2164_v47 }
 0x3fd   : > { %v2134_v39 = vpop.permute.xlu1 %2133 }
 0x3fe   : > { %2807 = vmatmul.msk.f32.vlgmr.msra.gmra.mxu0 %vm707_vm11, %v2134_v39 }
 0x403   : > { %2801 = vmatmul.msk.f32.vlgmr.msrb.gmra.mxu1 %vm707_vm11, %v2050_v27  ;;  %2805 = vmatmul.msk.f32.vlgmr.msrb.gmra.mxu3 %vm707_vm11, %v3886_v29 }
 0x40b   : > { %2809 = vmatmul.msk.f32.vlgmr.msra.gmra.mxu1 %vm707_vm11, %v2162_v49  ;;  %v1589_v51 = vpop.f32.mrf.mxu2 }
 0x40e   : > { %v1616_v13 = vpop.f32.mrf.mxu3 }
 0x410   : > { %v1643_v44 = vpop.f32.mrf.mxu0 }
 0x446   : > { %v1697_v60 = vpop.f32.mrf.mxu2 }
 0x448   : > { %v1670_v29 = vpop.f32.mrf.mxu1 }
 0x44e   : > { %v1801_v31 = vpop.f32.mrf.mxu2 }
 0x44f   : > { %v4074_v25 = vadd.f32 %v1801_v31, %v1589_v51 }
 0x450   : > { %v1751_v46 = vpop.f32.mrf.mxu0 }
 0x456   : > { %v1893_v8 = vpop.f32.mrf.mxu2 }
 0x457   : > { %v4076_v42 = vadd.f32 %v1893_v8, %v1697_v60 }
 0x458   : > { %v1847_v1 = vpop.f32.mrf.mxu0 }
 0x459   : > { %v4078_v2 = vadd.f32 %v1847_v1, %v1643_v44 }
 0x45e   : > { %v1990_v63 = vpop.f32.mrf.mxu2 }
 0x45f   : > { %v2189_v61 = vmul.f32 0.5, %v1990_v63 }
 0x460   : > { %v1939_v3 = vpop.f32.mrf.mxu0 }
 0x461   : > { %v4080_v48 = vadd.f32 %v1939_v3, %v1751_v46  ;;  %v2197_v26 = vsel %vm929_vm12, %v2189_v61, -inf }
 0x462   : > { %2198 = vmax.xlane.f32.xlu2 %v2197_v26 }
 0x466   : > { %v1724_v54 = vpop.f32.mrf.mxu3 }
 0x467   : > { %v2102_v59 = vpop.f32.mrf.mxu2 }
 0x468   : > { %v1778_v11 = vpop.f32.mrf.mxu1  ;;  %v2193_v28 = vmul.f32 0.5, %v2102_v59 }
 0x46a   : > { %v2046_v24 = vpop.f32.mrf.mxu0  ;;  %v2209_v37 = vsel %vm929_vm12, %v2193_v28, -inf }
 0x46b   : > { %v2191_v35 = vmul.f32 0.5, %v2046_v24 }
 0x46d   : > { %v2203_v18 = vsel %vm929_vm12, %v2191_v35, -inf }
 0x46e   : > { %2204 = vmax.xlane.f32.xlu0 %v2203_v18  ;;  %v1824_v62 = vpop.f32.mrf.mxu3 }
 0x46f   : > { %v4084_v22 = vadd.f32 %v1824_v62, %v1616_v13 }
 0x470   : > { %v1870_v4 = vpop.f32.mrf.mxu1 }
 0x471   : > { %v4086_v53 = vadd.f32 %v1870_v4, %v1670_v29 }
 0x476   : > { %v1916_v40 = vpop.f32.mrf.mxu3 }
 0x477   : > { %v4088_v15 = vadd.f32 %v1916_v40, %v1724_v54 }
 0x478   : > { %v1962_v23 = vpop.f32.mrf.mxu1 }
 0x479   : > { %v4090_v20 = vadd.f32 %v1962_v23, %v1778_v11 }
 0x47b   : > { %v2158_v50 = vpop.f32.mrf.mxu0 }
 0x47c   : > { %v2195_v41 = vmul.f32 0.5, %v2158_v50 }
 0x47e   : > { %v2018_v17 = vpop.f32.mrf.mxu3  ;;  %v2215_v14 = vsel %vm929_vm12, %v2195_v41, -inf }
 0x47f   : > { %v2190_v5 = vmul.f32 0.5, %v2018_v17 }
 0x480   : > { %v2074_v36 = vpop.f32.mrf.mxu1 }
 0x481   : > { %v2192_v43 = vmul.f32 0.5, %v2074_v36  ;;  %v2200_v19 = vsel %vm929_vm12, %v2190_v5, -inf }
 0x482   : > { %2201 = vmax.xlane.f32.xlu1 %v2200_v19 }
 0x483   : > { %v2206_v57 = vsel %vm929_vm12, %v2192_v43, -inf }
 0x484   : > { %2207 = vmax.xlane.f32.xlu2 %v2206_v57 }
 0x486   : > { %v2130_v58 = vpop.f32.mrf.mxu3 }
 0x487   : > { %v2194_v21 = vmul.f32 0.5, %v2130_v58 }
 0x488   : > { %v2186_v10 = vpop.f32.mrf.mxu1 }
 0x489   : > { %v2212_v55 = vsel %vm929_vm12, %v2194_v21, -inf  ;;  %v2196_v33 = vmul.f32 0.5, %v2186_v10 }
 0x48a   : > { %2213 = vmax.xlane.f32.xlu0 %v2212_v55  ;;  %2210 = vmax.xlane.f32.xlu1 %v2209_v37 }
 0x48b   : > { %v2218_v30 = vsel %vm929_vm12, %v2196_v33, -inf }
 0x48c   : > { %2216 = vmax.xlane.f32.xlu2 %v2215_v14 }
 0x492   : > { %2219 = vmax.xlane.f32.xlu1 %v2218_v30 }
 0x4d5   : > { %v2199_v12 = vpop.xlane.xlu2 %2198 }
 0x4d6   : > { %v2221_v9 = vsub.f32 %v2189_v61, %v2199_v12 }
 0x4d8   : > { %v2229_v45 = vmul.f32 1.442695, %v2221_v9 }
 0x4da   : > { %2997 = vpow2.f32 %v2229_v45 }
 0x4e0   : > { %v4098_v56 = vpop.eup %2997 }
 0x4e1   : > { %v2205_v34 = vpop.xlane.xlu0 %2204  ;;  %v2245_v38 = vsel %vm929_vm12, %v4098_v56, 0.0 }
 0x4e2   : > { %v2223_v0 = vsub.f32 %v2191_v35, %v2205_v34  ;;  %2246 = vadd.xlane.f32.xlu0 %v2245_v38 }
 0x4e4   : > { %v2233_v27 = vmul.f32 1.442695, %v2223_v0 }
 0x4e6   : > { %2999 = vpow2.f32 %v2233_v27 }
 0x4ec   : > { %v4102_v16 = vpop.eup %2999 }
 0x4ed   : > { %v2251_v47 = vsel %vm929_vm12, %v4102_v16, 0.0 }
 0x4ee   : > { %2252 = vadd.xlane.f32.xlu1 %v2251_v47 }
 0x4f5   : > { %v2202_v39 = vpop.xlane.xlu1 %2201 }
 0x4f6   : > { %v2222_v49 = vsub.f32 %v2190_v5, %v2202_v39 }
 0x4f7   : > { %v2208_v51 = vpop.xlane.xlu2 %2207 }
 0x4f8   : > { %v2231_v60 = vmul.f32 1.442695, %v2222_v49  ;;  %v2224_v44 = vsub.f32 %v2192_v43, %v2208_v51 }
 0x4fa   : > { %3001 = vpow2.f32 %v2231_v60  ;;  %v2235_v31 = vmul.f32 1.442695, %v2224_v44 }
 0x4fc   : > { %3003 = vpow2.f32 %v2235_v31 }
 0x4fd   : > { %v2214_v46 = vpop.xlane.xlu0 %2213  ;;  %v2211_v8 = vpop.xlane.xlu1 %2210 }
 0x4fe   : > { %v2226_v1 = vsub.f32 %v2194_v21, %v2214_v46  ;;  %v2225_v13 = vsub.f32 %v2193_v28, %v2211_v8 }
 0x4ff   : > { %v2217_v63 = vpop.xlane.xlu2 %2216 }
 0x500   : > { %v4106_v61 = vpop.eup %3001  ;;  %v2239_v29 = vmul.f32 1.442695, %v2226_v1  ;;  %v2237_v3 = vmul.f32 1.442695, %v2225_v13  ;;  %v2227_v26 = vsub.f32 %v2195_v41, %v2217_v63  ;;  %v4158_v63 = vld [vmem:[%s4357_s5 + $0x10] sm:$0xff] }
 0x501   : > { %v2248_v54 = vsel %vm929_vm12, %v4106_v61, 0.0 }
 0x502   : > { %v4110_v11 = vpop.eup %3003  ;;  %3005 = vpow2.f32 %v2239_v29  ;;  %v2241_v24 = vmul.f32 1.442695, %v2227_v26  ;;  %2249 = vadd.xlane.f32.xlu2 %v2248_v54 }
 0x503   : > { %3007 = vpow2.f32 %v2237_v3  ;;  %v2254_v35 = vsel %vm929_vm12, %v4110_v11, 0.0 }
 0x504   : > { %3009 = vpow2.f32 %v2241_v24  ;;  %2255 = vadd.xlane.f32.xlu0 %v2254_v35 }
 0x505   : > { %v2220_v18 = vpop.xlane.xlu1 %2219 }
 0x506   : > { %v2228_v62 = vsub.f32 %v2196_v33, %v2220_v18 }
 0x508   : > { %v4114_v4 = vpop.eup %3005  ;;  %v2243_v40 = vmul.f32 1.442695, %v2228_v62 }
 0x509   : > { %v4116_v23 = vpop.eup %3007  ;;  %v2260_v17 = vsel %vm929_vm12, %v4114_v4, 0.0 }
 0x50a   : > { %v4120_v5 = vpop.eup %3009  ;;  %3011 = vpow2.f32 %v2243_v40  ;;  %2261 = vadd.xlane.f32.xlu1 %v2260_v17  ;;  %v2257_v36 = vsel %vm929_vm12, %v4116_v23, 0.0 }
 0x50b   : > { %2258 = vadd.xlane.f32.xlu2 %v2257_v36  ;;  %v2263_v43 = vsel %vm929_vm12, %v4120_v5, 0.0 }
 0x50c   : > { %2264 = vadd.xlane.f32.xlu0 %v2263_v43 }
 0x510   : > { %v4126_v19 = vpop.eup %3011 }
 0x511   : > { %v2266_v59 = vsel %vm929_vm12, %v4126_v19, 0.0 }
 0x513   : > { %2267 = vadd.xlane.f32.xlu2 %v2266_v59 }
 0x520   : > { %2897 = vrot.lane.b32.xlu0 %v3664_v32, %s3112_s24 }
 0x523   : > { %2892 = vrot.lane.b32.xlu1 %v3554_v52, %s3112_s24 }
 0x528   : > { %2907 = vrot.lane.b32.xlu0 %v3737_v7, %s3112_s24 }
 0x52b   : > { %2902 = vrot.lane.b32.xlu2 %v3582_v6, %s3112_s24 }
 0x555   : > { %v2247_v57 = vpop.xlane.xlu0 %2246 }
 0x556   : > { %3013 = vrcp.f32 %v2247_v57  ;;  %v2280_v52 = vand.u32 2147483648, %v2247_v57  ;;  %vm2274_vm10 = vweird.f32 %v2247_v57  ;;  %v2278_v7 = vand.u32 2147483647, %v2247_v57 }
 0x558   : > { %v2281_v45 = vor.u32 1.1754944e-38, %v2280_v52  ;;  %vm2279_vm1 = vcmp.eq.f32.partialorder %v2278_v7, 8.507059e+37 }
 0x55c   : > { %v3014_v28 = vpop.eup %3013 }
 0x55d   : > { %v2270_v41 = vmul.f32 %v3014_v28, %v2247_v57  ;;  %vm2275_vm11 = vweird.f32 %v3014_v28 }
 0x55e   : > { %vm2276_vm13 = vmor %vm2274_vm10, %vm2275_vm11 }
 0x55f   : > { %v2271_v55 = vsub.f32 1.0, %v2270_v41 }
 0x561   : > { %v2253_v50 = vpop.xlane.xlu1 %2252  ;;  %v2272_v10 = vmul.f32 %v3014_v28, %v2271_v55 }
 0x562   : > { %3015 = vrcp.f32 %v2253_v50  ;;  %v2310_v9 = vand.u32 2147483648, %v2253_v50  ;;  %vm2304_vm15 = vweird.f32 %v2253_v50  ;;  %v2308_v34 = vand.u32 2147483647, %v2253_v50 }
 0x563   : > { %v2273_v32 = vadd.f32 %v3014_v28, %v2272_v10 }
 0x564   : > { %v2311_v51 = vor.u32 1.1754944e-38, %v2310_v9  ;;  %vm2309_vm3 = vcmp.eq.f32.partialorder %v2308_v34, 8.507059e+37 }
 0x565   : > { %v2277_v12 = vsel %vm2276_vm13, %v3014_v28, %v2273_v32 }
 0x566   : > { %v2282_v0 = vsel %vm2279_vm1, %v2281_v45, %v2277_v12 }
 0x567   : > { %v2283_v46 = vmul.f32 %v4098_v56, %v2282_v0 }
 0x568   : > { %v3016_v58 = vpop.eup %3015 }
 0x569   : > { %v2300_v21 = vmul.f32 %v3016_v58, %v2253_v50  ;;  %vm2305_vm14 = vweird.f32 %v3016_v58  ;;  %v4165_v24 = vmul.f32 %v4158_v63, %v2283_v46 }
 0x56a   : > { %vm2306_vm2 = vmor %vm2304_vm15, %vm2305_vm14 }
 0x56b   : > { %v2301_v37 = vsub.f32 1.0, %v2300_v21 }
 0x56d   : > { %v2302_v14 = vmul.f32 %v3016_v58, %v2301_v37 }
 0x56f   : > { %v2303_v30 = vadd.f32 %v3016_v58, %v2302_v14 }
 0x571   : > { %v2307_v27 = vsel %vm2306_vm2, %v3016_v58, %v2303_v30 }
 0x572   : > { %v2312_v8 = vsel %vm2309_vm3, %v2311_v51, %v2307_v27 }
 0x573   : > { %v2313_v29 = vmul.f32 %v4102_v16, %v2312_v8 }
 0x575   : > { %v4134_v33 = vpop.xlane.xlu2 %2249  ;;  %v4185_v57 = vmul.f32 %v4158_v63, %v2313_v29 }
 0x576   : > { %3017 = vrcp.f32 %v4134_v33  ;;  %v2293_v35 = vand.u32 2147483647, %v4134_v33  ;;  %v2295_v18 = vand.u32 2147483648, %v4134_v33  ;;  %vm2289_vm7 = vweird.f32 %v4134_v33 }
 0x577   : > { %v4137_v6 = vpop.xlane.xlu0 %2255 }
 0x578   : > { %3019 = vrcp.f32 %v4137_v6  ;;  %v2323_v62 = vand.u32 2147483647, %v4137_v6  ;;  %v2325_v17 = vand.u32 2147483648, %v4137_v6  ;;  %vm2319_vm6 = vweird.f32 %v4137_v6 }
 0x579   : > { %vm4191_vm8 = vcmp.eq.f32.partialorder %v2293_v35, 8.507059e+37  ;;  %v2296_v55 = vor.u32 1.1754944e-38, %v2295_v18 }
 0x57a   : > { %vm2324_vm11 = vcmp.eq.f32.partialorder %v2323_v62, 8.507059e+37  ;;  %v2326_v14 = vor.u32 1.1754944e-38, %v2325_v17 }
 0x57c   : > { %v4140_v38 = vpop.eup %3017 }
 0x57d   : > { %v2285_v47 = vmul.f32 %v4140_v38, %v4134_v33  ;;  %v4144_v39 = vpop.xlane.xlu1 %2261  ;;  %vm2290_vm5 = vweird.f32 %v4140_v38 }
 0x57e   : > { %v3020_v49 = vpop.eup %3019  ;;  %v4146_v60 = vpop.xlane.xlu2 %2258  ;;  %3021 = vrcp.f32 %v4144_v39  ;;  %v2353_v32 = vand.u32 2147483647, %v4144_v39  ;;  %vm4205_vm10 = vmor %vm2289_vm7, %vm2290_vm5  ;;  %vm2349_vm14 = vweird.f32 %v4144_v39  ;;  %v2355_v7 = vand.u32 2147483648, %v4144_v39 }
 0x57f   : > { %v2315_v44 = vmul.f32 %v3020_v49, %v4137_v6  ;;  %3023 = vrcp.f32 %v4146_v60  ;;  %v4151_v31 = vpop.xlane.xlu0 %2264  ;;  %v2286_v1 = vsub.f32 1.0, %v2285_v47  ;;  %vm2320_vm4 = vweird.f32 %v3020_v49 }
 0x580   : > { %3025 = vrcp.f32 %v4151_v31  ;;  %vm4196_vm9 = vmor %vm2319_vm6, %vm2320_vm4  ;;  %vm2334_vm13 = vweird.f32 %v4146_v60  ;;  %v2338_v6 = vand.u32 2147483647, %v4146_v60  ;;  %v2340_v27 = vand.u32 2147483648, %v4146_v60 }
 0x581   : > { %v2316_v13 = vsub.f32 1.0, %v2315_v44  ;;  %v2287_v54 = vmul.f32 %v4140_v38, %v2286_v1  ;;  %v2368_v47 = vand.u32 2147483647, %v4151_v31  ;;  %vm4222_vm15 = vcmp.eq.f32.partialorder %v2353_v32, 8.507059e+37 }
 0x582   : > { %vm2364_vm4 = vweird.f32 %v4151_v31 }
 0x583   : > { %v2317_v3 = vmul.f32 %v3020_v49, %v2316_v13  ;;  %v2288_v50 = vadd.f32 %v4140_v38, %v2287_v54  ;;  %vm4241_vm6 = vcmp.eq.f32.partialorder %v2368_v47, 8.507059e+37 }
 0x584   : > { %v4161_v26 = vpop.eup %3021 }
 0x585   : > { %v4167_v56 = vpop.eup %3023  ;;  %v2345_v40 = vmul.f32 %v4161_v26, %v4144_v39  ;;  %v2318_v16 = vadd.f32 %v3020_v49, %v2317_v3  ;;  %v2292_v30 = vsel %vm4205_vm10, %v4140_v38, %v2288_v50  ;;  %vm2350_vm3 = vweird.f32 %v4161_v26 }
 0x586   : > { %v2330_v36 = vmul.f32 %v4167_v56, %v4146_v60  ;;  %v4177_v43 = vpop.xlane.xlu2 %2267  ;;  %v4179_v59 = vpop.eup %3025  ;;  %v2297_v46 = vsel %vm4191_vm8, %v2296_v55, %v2292_v30  ;;  %vm2335_vm2 = vweird.f32 %v4167_v56  ;;  %v2356_v3 = vor.u32 1.1754944e-38, %v2355_v7  ;;  %vm4248_vm7 = vmor %vm2349_vm14, %vm2350_vm3 }
 0x587   : > { %3027 = vrcp.f32 %v4177_v43  ;;  %v2346_v58 = vsub.f32 1.0, %v2345_v40  ;;  %v2360_v41 = vmul.f32 %v4179_v59, %v4151_v31  ;;  %v2322_v10 = vsel %vm4196_vm9, %v3020_v49, %v2318_v16  ;;  %vm4261_vm9 = vmor %vm2334_vm13, %vm2335_vm2 }
 0x588   : > { %v2331_v28 = vsub.f32 1.0, %v2330_v36  ;;  %v2327_v0 = vsel %vm2324_vm11, %v2326_v14, %v2322_v10  ;;  %v2370_v49 = vand.u32 2147483648, %v4151_v31  ;;  %vm2365_vm1 = vweird.f32 %v4179_v59 }
 0x589   : > { %v2361_v52 = vsub.f32 1.0, %v2360_v41  ;;  %v2347_v9 = vmul.f32 %v4161_v26, %v2346_v58  ;;  %v2328_v8 = vmul.f32 %v4110_v11, %v2327_v0  ;;  %vm4237_vm5 = vmor %vm2364_vm4, %vm2365_vm1  ;;  %v2385_v62 = vand.u32 2147483648, %v4177_v43 }
 0x58a   : > { %v2332_v12 = vmul.f32 %v4167_v56, %v2331_v28  ;;  %v2371_v18 = vor.u32 1.1754944e-38, %v2370_v49  ;;  %v2383_v16 = vand.u32 2147483647, %v4177_v43  ;;  %v2298_v36 = vmul.f32 %v4106_v61, %v2297_v46 }
 0x58b   : > { %v2362_v45 = vmul.f32 %v4179_v59, %v2361_v52  ;;  %v2348_v13 = vadd.f32 %v4161_v26, %v2347_v9  ;;  %vm2379_vm11 = vweird.f32 %v4177_v43  ;;  %v2394_v41 = vmul.f32 %v4158_v63, %v2328_v8  ;;  %v3030_v8 = vld [vmem:[%s3227_s11 + $0x18] sm:$0xff] }
 0x58c   : > { %v2333_v1 = vadd.f32 %v4167_v56, %v2332_v12  ;;  %vm2339_vm10 = vcmp.eq.f32.partialorder %v2338_v6, 8.507059e+37  ;;  %v2341_v60 = vor.u32 1.1754944e-38, %v2340_v27  ;;  %vm2384_vm14 = vcmp.eq.f32.partialorder %v2383_v16, 8.507059e+37 }
 0x58d   : > { %v3028_v34 = vpop.eup %3027  ;;  %v2363_v38 = vadd.f32 %v4179_v59, %v2362_v45  ;;  %v2352_v61 = vsel %vm4248_vm7, %v4161_v26, %v2348_v13  ;;  %v2392_v33 = vmul.f32 %v4158_v63, %v2298_v36  ;;  %v3031_v36 = vld [vmem:[%s3227_s11 + $0x30] sm:$0xff] }
 0x58e   : > { %v2375_v44 = vmul.f32 %v3028_v34, %v4177_v43  ;;  %vm2380_vm8 = vweird.f32 %v3028_v34  ;;  %v2386_v43 = vor.u32 1.1754944e-38, %v2385_v62  ;;  %v2903_v55 = vpop.permute.xlu2 %2902  ;;  %v2357_v32 = vsel %vm4222_vm15, %v2356_v3, %v2352_v61 }
 0x58f   : > { %v2367_v31 = vsel %vm4237_vm5, %v4179_v59, %v2363_v38  ;;  %v2337_v59 = vsel %vm4261_vm9, %v4167_v56, %v2333_v1  ;;  %vm2381_vm13 = vmor %vm2379_vm11, %vm2380_vm8  ;;  %v2905_v30 = vunpack.i.h.bf16 %v2903_v55  ;;  %v2904_v12 = vunpack.i.l.bf16 %v2903_v55 }
 0x590   : > { %v2376_v29 = vsub.f32 1.0, %v2375_v44  ;;  %v2372_v21 = vsel %vm4241_vm6, %v2371_v18, %v2367_v31  ;;  %v2342_v26 = vsel %vm2339_vm10, %v2341_v60, %v2337_v59  ;;  %v2358_v45 = vmul.f32 %v4114_v4, %v2357_v32  ;;  %v2914_v4 = vld [vmem:[%s4359_s7] ss:$0 sm:$0xff]  ;;  %v3029_v44 = vld [vmem:[%s3227_s11 + $0x10] sm:$0xff]  ;;  %v3034_v59 = vld [vmem:[%s3227_s11 + $0x8] sm:$0xff] }
 0x591   : > { %v2373_v6 = vmul.f32 %v4120_v5, %v2372_v21  ;;  %v2343_v9 = vmul.f32 %v4116_v23, %v2342_v26  ;;  %v3036_v26 = vld [vmem:[%s3227_s11 + $0x28] sm:$0xff] }
 0x592   : > { %v2377_v40 = vmul.f32 %v3028_v34, %v2376_v29  ;;  %v2898_v17 = vpop.permute.xlu0 %2897  ;;  %v2396_v27 = vmul.f32 %v4158_v63, %v2358_v45 }
 0x593   : > { %v2900_v50 = vunpack.i.h.bf16 %v2898_v17  ;;  %v2899_v28 = vunpack.i.l.bf16 %v2898_v17 }
 0x594   : > { %v2378_v58 = vadd.f32 %v3028_v34, %v2377_v40 }
 0x595   : > { %2472 = vmatpush.msrb.mxu0 %v2899_v28  ;;  %2498 = vmatpush.msrb.mxu1 %v2900_v50  ;;  %v2893_v37 = vpop.permute.xlu1 %2892  ;;  %v3033_v50 = vld [vmem:[%s3227_s11] sm:$0xff] }
 0x596   : > { %v2382_v56 = vsel %vm2381_vm13, %v3028_v34, %v2378_v58  ;;  %v2895_v10 = vunpack.i.h.bf16 %v2893_v37  ;;  %v2894_v14 = vunpack.i.l.bf16 %v2893_v37  ;;  %2813 = vmatmul.msk.f32.vlgmr.msrb.gmra.mxu0 %vm929_vm12, %v4185_v57  ;;  %2814 = vmatmul.msk.f32.vlgmr.msrb.gmra.mxu1 %vm929_vm12, %v2394_v41 }
 0x597   : > { %v2387_v52 = vsel %vm2384_vm14, %v2386_v43, %v2382_v56 }
 0x598   : > { %v2388_v7 = vmul.f32 %v4126_v19, %v2387_v52  ;;  %2420 = vmatpush.msra.mxu2 %v2894_v14  ;;  %2446 = vmatpush.msra.mxu3 %v2895_v10  ;;  %v2397_v19 = vmul.f32 %v4158_v63, %v2373_v6  ;;  %v3035_v10 = vld [vmem:[%s3227_s11 + $0x20] sm:$0xff] }
 0x599   : > { %2811 = vmatmul.msk.f32.vlgmr.msra.gmra.mxu2 %vm929_vm12, %v4165_v24  ;;  %2812 = vmatmul.msk.f32.vlgmr.msra.gmra.mxu3 %vm929_vm12, %v2392_v33  ;;  %v2395_v24 = vmul.f32 %v4158_v63, %v2343_v9 }
 0x59a   : > { %2524 = vmatpush.msrb.mxu2 %v2904_v12  ;;  %2550 = vmatpush.msrb.mxu3 %v2905_v30  ;;  %v2908_v57 = vpop.permute.xlu0 %2907  ;;  %v2398_v0 = vmul.f32 %v4158_v63, %v2388_v7 }
 0x59b   : > { %v2910_v5 = vunpack.i.h.bf16 %v2908_v57  ;;  %v2909_v34 = vunpack.i.l.bf16 %v2908_v57 }
 0x59d   : > { %2576 = vmatpush.msra.mxu0 %v2909_v34  ;;  %2602 = vmatpush.msra.mxu1 %v2910_v5 }
 0x59e   : > { %2817 = vmatmul.msk.f32.vlgmr.msra.gmra.mxu0 %vm929_vm12, %v2397_v19  ;;  %2818 = vmatmul.msk.f32.vlgmr.msra.gmra.mxu1 %vm929_vm12, %v2398_v0 }
 0x5a1   : > { %2815 = vmatmul.msk.f32.vlgmr.msrb.gmra.mxu2 %vm929_vm12, %v2395_v24  ;;  %2816 = vmatmul.msk.f32.vlgmr.msrb.gmra.mxu3 %vm929_vm12, %v2396_v27 }
 0x613   : > { %v2474_v23 = vpop.f32.mrf.mxu0  ;;  %v2500_v47 = vpop.f32.mrf.mxu1 }
 0x614   : > { %v2609_v49 = vadd.f32 %v2474_v23, %v4078_v2  ;;  %v2610_v51 = vadd.f32 %v2500_v47, %v4086_v53 }
 0x616   : > { %v2621_v63 = vadd.f32 %v2914_v4, %v2609_v49  ;;  %v2622_v38 = vadd.f32 %v2914_v4, %v2610_v51 }
 0x618   : > { %v2629_v46 = vadd.f32 %v3029_v44, %v2621_v63  ;;  %v2630_v1 = vadd.f32 %v3030_v8, %v2622_v38 }
 0x61a   : > { %v2637_v13 = vmax.f32 %v2629_v46, 0.0  ;;  %v2638_v29 = vmax.f32 %v2630_v1, 0.0 }
 0x61b   : > { %v2578_v2 = vpop.f32.mrf.mxu0  ;;  %v2604_v53 = vpop.f32.mrf.mxu1 }
 0x61c   : > { %2645 = vst.msk [vmem:[%s4309_s19 + $0x10] sm:$0xff] %vm338_vm0, %v2637_v13  ;;  %v2613_v3 = vadd.f32 %v2578_v2, %v4080_v48  ;;  %v2614_v54 = vadd.f32 %v2604_v53, %v4090_v20  ;;  %v2422_v35 = vpop.f32.mrf.mxu2  ;;  %v2448_v18 = vpop.f32.mrf.mxu3  ;;  %v3032_v48 = vld [vmem:[%s3227_s11 + $0x38] sm:$0xff] }
 0x61d   : > { %2646 = vst.msk [vmem:[%s4309_s19 + $0x18] sm:$0xff] %vm338_vm0, %v2638_v29  ;;  %v2607_v62 = vadd.f32 %v2422_v35, %v4074_v25  ;;  %v2608_v11 = vadd.f32 %v2448_v18, %v4084_v22 }
 0x61e   : > { %v2625_v31 = vadd.f32 %v2914_v4, %v2613_v3  ;;  %v2626_v40 = vadd.f32 %v2914_v4, %v2614_v54 }
 0x61f   : > { %v2619_v16 = vadd.f32 %v2914_v4, %v2607_v62  ;;  %v2620_v17 = vadd.f32 %v2914_v4, %v2608_v11 }
 0x620   : > { %v2633_v39 = vadd.f32 %v3031_v36, %v2625_v31  ;;  %v2634_v20 = vadd.f32 %v3032_v48, %v2626_v40 }
 0x621   : > { %v2627_v28 = vadd.f32 %v3033_v50, %v2619_v16  ;;  %v2628_v61 = vadd.f32 %v3034_v59, %v2620_v17 }
 0x622   : > { %v2641_v25 = vmax.f32 %v2633_v39, 0.0  ;;  %v2642_v22 = vmax.f32 %v2634_v20, 0.0 }
 0x623   : > { %v2635_v58 = vmax.f32 %v2627_v28, 0.0  ;;  %v2636_v41 = vmax.f32 %v2628_v61, 0.0 }
 0x624   : > { %2649 = vst.msk [vmem:[%s4309_s19 + $0x30] sm:$0xff] %vm338_vm0, %v2641_v25  ;;  %v2526_v60 = vpop.f32.mrf.mxu2  ;;  %v2552_v21 = vpop.f32.mrf.mxu3 }
 0x625   : > { %2650 = vst.msk [vmem:[%s4309_s19 + $0x38] sm:$0xff] %vm338_vm0, %v2642_v22  ;;  %v2611_v43 = vadd.f32 %v2526_v60, %v4076_v42  ;;  %v2612_v55 = vadd.f32 %v2552_v21, %v4088_v15 }
 0x626   : > { %2643 = vst.msk [vmem:[%s4309_s19] sm:$0xff] %vm338_vm0, %v2635_v58 }
 0x627   : > { %2644 = vst.msk [vmem:[%s4309_s19 + $0x8] sm:$0xff] %vm338_vm0, %v2636_v41  ;;  %v2623_v37 = vadd.f32 %v2914_v4, %v2611_v43  ;;  %v2624_v56 = vadd.f32 %v2914_v4, %v2612_v55 }
 0x629   : > { %v2631_v14 = vadd.f32 %v3035_v10, %v2623_v37  ;;  %v2632_v32 = vadd.f32 %v3036_v26, %v2624_v56 }
 0x62b   : > { %v2639_v52 = vmax.f32 %v2631_v14, 0.0  ;;  %v2640_v33 = vmax.f32 %v2632_v32, 0.0 }
 0x62d   : > { %2647 = vst.msk [vmem:[%s4309_s19 + $0x20] sm:$0xff] %vm338_vm0, %v2639_v52 }
 0x62e   : > { %2648 = vst.msk [vmem:[%s4309_s19 + $0x28] sm:$0xff] %vm338_vm0, %v2640_v33 }
 0x62f PF: > { %p18_p7 = scmp.ge.s32.totalorder %s3178_s10, 4   ;;  %s4392_s27 = smov %s3093_s28 }
 0x630   : > { %s4393_s28 = smov %s3097_s29  ;;  %s4394_s29 = smov %s3188_s13 }
 0x631   : > { %s4395_s30 = smov %s3178_s10  ;;  %20 = sbr.rel (!%p18_p7) target bundleno = 3 (0x3), region = 94 }
 0x636   :  { %2673 = vsyncpa [#allocation3], 1 }
 0x637   :  { %2675 = vsyncpa [#allocation3 + $0x1], 1 }

</bundles_post_ra>
